<compile_context>
chip_gen: v6e
topology: v6e:2x2x1
jax: 0.10.0
libtpu: 0.0.40
codegen_flags: <defaults>
</compile_context>

<pallas_src>
import jax
import jax.numpy as jnp
from jax.experimental import pallas as pl
from jax.experimental.pallas import tpu as pltpu


# ----------------------------------------------------------------------------
# Pallas kernel: one time-chunk of both LSTM directions, interleaved.
# ----------------------------------------------------------------------------
def _bilstm_kernel(gxf_ref, gxb_ref, whh_ref,
                   of_ref, ob_ref, h_ref, c_ref,
                   hf_sc, cf_sc, hb_sc, cb_sc):
    """gxf_ref: (Tc, B, 4H) forward x-projection(+bias), chunk k (natural time).
    gxb_ref: (Tc, B, 4H) backward x-projection(+bias), chunk N-1-k.
    whh_ref: (2, H, 4H) recurrent weights, gate order [i, f, o, g].
    of_ref/ob_ref: (Tc, B, H) per-direction output chunks.
    h_ref/c_ref:   (2, B, H) final states (written on last grid step).
    *_sc: (B, H) VMEM scratch carrying (h, c) per direction across chunks."""
    k = pl.program_id(0)
    tc, _, g4 = gxf_ref.shape
    hd = g4 // 4

    @pl.when(k == 0)
    def _():
        hf_sc[...] = jnp.zeros_like(hf_sc)
        cf_sc[...] = jnp.zeros_like(cf_sc)
        hb_sc[...] = jnp.zeros_like(hb_sc)
        cb_sc[...] = jnp.zeros_like(cb_sc)

    whh_f = whh_ref[0]                           # (H, 4H), loaded once per chunk
    whh_b = whh_ref[1]

    def cell(gx_row, h_prev, c_prev, whh):
        # (B, 4H) gates = precomputed x-projection(+bias) + recurrent matmul.
        gates = gx_row + jnp.dot(h_prev, whh,
                                 preferred_element_type=jnp.float32)
        # Gate order [i, f, o, g]: one contiguous 3H sigmoid + one H tanh.
        sig = jax.nn.sigmoid(gates[:, : 3 * hd])
        g_g = jnp.tanh(gates[:, 3 * hd:])
        i_g = sig[:, :hd]
        f_g = sig[:, hd:2 * hd]
        o_g = sig[:, 2 * hd:3 * hd]
        c_new = f_g * c_prev + i_g * g_g
        h_new = o_g * jnp.tanh(c_new)
        return h_new, c_new

    h_f, c_f = hf_sc[...], cf_sc[...]
    h_b, c_b = hb_sc[...], cb_sc[...]

    # Static Python loop over the bounded chunk: every load/store offset below
    # is a compile-time constant, and the two independent direction
    # recurrences interleave for 2-way ILP on the latency-bound serial path.
    for s in range(tc):
        h_f, c_f = cell(gxf_ref[s], h_f, c_f, whh_f)
        of_ref[s] = h_f
        tb = tc - 1 - s                          # backward walks its chunk in reverse
        h_b, c_b = cell(gxb_ref[tb], h_b, c_b, whh_b)
        ob_ref[tb] = h_b

    hf_sc[...] = h_f
    cf_sc[...] = c_f
    hb_sc[...] = h_b
    cb_sc[...] = c_b

    @pl.when(k == pl.num_programs(0) - 1)
    def _():
        h_ref[0] = h_f
        h_ref[1] = h_b
        c_ref[0] = c_f
        c_ref[1] = c_b


def _pick_chunk(t, target=8):
    """Largest chunk <= target that divides T (keeps block shapes exact)."""
    tc = max(1, min(t, target))
    while t % tc:
        tc -= 1
    return tc


def _bilstm(gxf, gxb, whh, *, chunk=8):
    """gxf/gxb: (T, B, 4H) f32 x-projection(+bias), time-major, per direction.
    whh: (2, H, 4H) f32, gate order [i, f, o, g].
    Returns out_f (T,B,H), out_b (T,B,H), h (2,B,H), c (2,B,H)."""
    t, b, g4 = gxf.shape
    hd = g4 // 4
    assert whh.shape == (2, hd, g4)
    tc = _pick_chunk(t, chunk)
    n_chunks = t // tc

    grid_spec = pltpu.PrefetchScalarGridSpec(
        num_scalar_prefetch=0,
        grid=(n_chunks,),
        in_specs=[
            # forward gate chunks in natural order
            pl.BlockSpec((tc, b, g4), lambda k: (k, 0, 0)),
            # backward gate chunks in reversed chunk order (no HBM reverse copy)
            pl.BlockSpec((tc, b, g4), lambda k: (n_chunks - 1 - k, 0, 0)),
            # recurrent weights, fully resident (constant block index)
            pl.BlockSpec((2, hd, g4), lambda k: (0, 0, 0)),
        ],
        out_specs=[
            pl.BlockSpec((tc, b, hd), lambda k: (k, 0, 0)),
            pl.BlockSpec((tc, b, hd), lambda k: (n_chunks - 1 - k, 0, 0)),
            pl.BlockSpec((2, b, hd), lambda k: (0, 0, 0)),
            pl.BlockSpec((2, b, hd), lambda k: (0, 0, 0)),
        ],
        scratch_shapes=[pltpu.VMEM((b, hd), jnp.float32) for _ in range(4)],
    )

    return pl.pallas_call(
        _bilstm_kernel,
        out_shape=(
            jax.ShapeDtypeStruct((t, b, hd), jnp.float32),
            jax.ShapeDtypeStruct((t, b, hd), jnp.float32),
            jax.ShapeDtypeStruct((2, b, hd), jnp.float32),
            jax.ShapeDtypeStruct((2, b, hd), jnp.float32),
        ),
        grid_spec=grid_spec,
        compiler_params=pltpu.CompilerParams(
            # chunk axis carries (h, c) state across iterations -> sequential
            dimension_semantics=("arbitrary",)),
    )(gxf, gxb, whh)


# ----------------------------------------------------------------------------
# Encoder forward (glue in plain JAX, recurrence hot path in Pallas)
# ----------------------------------------------------------------------------
def init_encoder_params(key, vocab_size, embed_dim, hidden_dim):
    ks = jax.random.split(key, 9)
    scale = 1.0 / jnp.sqrt(hidden_dim)
    u = lambda k, shape: jax.random.uniform(k, shape, jnp.float32, -scale, scale)
    return {
        "embedding": jax.random.normal(ks[0], (vocab_size, embed_dim), jnp.float32),
        # Per-direction weights (dir 0 = forward, dir 1 = backward), stored
        # transposed (W^T: (E,4H)/(H,4H)) with gate columns in [i, f, o, g]
        # order -- a pure column permutation of torch.nn.LSTM's [i, f, g, o]
        # (internal storage only; LSTM semantics are identical).  To load
        # torch weights, permute their gate blocks [i,f,g,o] -> [i,f,o,g].
        "wih": jnp.stack([u(ks[1], (embed_dim, 4 * hidden_dim)),
                          u(ks[2], (embed_dim, 4 * hidden_dim))], axis=0),
        "whh": jnp.stack([u(ks[3], (hidden_dim, 4 * hidden_dim)),
                          u(ks[4], (hidden_dim, 4 * hidden_dim))], axis=0),
        # bias = b_ih + b_hh (torch applies both; summed here).
        "bias": jnp.stack([u(ks[5], (4 * hidden_dim,)) + u(ks[6], (4 * hidden_dim,)),
                           u(ks[7], (4 * hidden_dim,)) + u(ks[8], (4 * hidden_dim,))],
                          axis=0),
    }


@jax.jit
def encoder_forward(params, inputs):
    """inputs: (B, T) int32 token ids.
    Returns: outputs (B, T, 2H), hidden (2, B, H), cell (2, B, H)."""
    emb = jnp.take(params["embedding"], inputs, axis=0)            # (B, T, E)
    # TODO(synk): dropout implemented with eval-mode semantics (identity);
    # training-mode dropout would need pltpu.prng_* masking inside the kernel.
    # TODO(synk): for production v6e/v7x, store gates_x / W_hh / h in bf16
    # (f32 accumulation and f32 cell state) to halve HBM/VMEM traffic.

    # Hoisted input projection (+bias) per direction, time-major (T, B, 4H):
    # fully parallel MXU work, entirely off the serial recurrence path.
    gxf = jnp.einsum("bte,eg->tbg", emb, params["wih"][0],
                     preferred_element_type=jnp.float32) + params["bias"][0]
    gxb = jnp.einsum("bte,eg->tbg", emb, params["wih"][1],
                     preferred_element_type=jnp.float32) + params["bias"][1]

    out_f, out_b, hidden, cell = _bilstm(gxf, gxb, params["whh"])

    # PyTorch batch_first layout: (B, T, 2H) with [forward, backward] features.
    outputs = jnp.transpose(jnp.concatenate([out_f, out_b], axis=-1), (1, 0, 2))
    return outputs, hidden, cell


# ----------------------------------------------------------------------------
# Pure-JAX reference (lax.scan LSTM) for correctness checking.
# ----------------------------------------------------------------------------
def _lstm_ref_direction(x_tbe, w_ih, w_hh, b):
    _, bsz, _ = x_tbe.shape
    hd = w_hh.shape[0]

    def step(carry, x_t):
        h, c = carry
        gates = x_t @ w_ih + h @ w_hh + b
        i = jax.nn.sigmoid(gates[:, :hd])
        f = jax.nn.sigmoid(gates[:, hd:2 * hd])
        o = jax.nn.sigmoid(gates[:, 2 * hd:3 * hd])
        g = jnp.tanh(gates[:, 3 * hd:])
        c = f * c + i * g
        h = o * jnp.tanh(c)
        return (h, c), h

    init = (jnp.zeros((bsz, hd), jnp.float32), jnp.zeros((bsz, hd), jnp.float32))
    (h, c), ys = jax.lax.scan(step, init, x_tbe)
    return ys, h, c


def encoder_reference(params, inputs):
    emb = jnp.take(params["embedding"], inputs, axis=0)
    x_tbe = jnp.transpose(emb, (1, 0, 2))
    of, hf, cf = _lstm_ref_direction(x_tbe, params["wih"][0], params["whh"][0],
                                     params["bias"][0])
    ob, hb, cb = _lstm_ref_direction(x_tbe[::-1], params["wih"][1], params["whh"][1],
                                     params["bias"][1])
    ob = ob[::-1]
    outputs = jnp.transpose(jnp.concatenate([of, ob], axis=-1), (1, 0, 2))
    return outputs, jnp.stack([hf, hb], axis=0), jnp.stack([cf, cb], axis=0)


if __name__ == "__main__":
    vocab_size, embed_dim, hidden_dim = 50, 32, 32
    batch, seq = 2, 16   # seq=16 with chunk=8 exercises the cross-chunk carry

    key = jax.random.PRNGKey(0)
    k_param, k_tok = jax.random.split(key)
    params = init_encoder_params(k_param, vocab_size, embed_dim, hidden_dim)
    tokens = jax.random.randint(k_tok, (batch, seq), 0, vocab_size, dtype=jnp.int32)

    outputs, hidden, cell = encoder_forward(params, tokens)
    jax.block_until_ready((outputs, hidden, cell))

    assert outputs.shape == (batch, seq, 2 * hidden_dim)
    assert hidden.shape == (2, batch, hidden_dim)
    assert cell.shape == (2, batch, hidden_dim)

    # Numerical check against a pure-JAX reference bidirectional LSTM.
    ref_out, ref_h, ref_c = encoder_reference(params, tokens)
    assert jnp.allclose(outputs, ref_out, atol=1e-4, rtol=1e-4)
    assert jnp.allclose(hidden, ref_h, atol=1e-4, rtol=1e-4)
    assert jnp.allclose(cell, ref_c, atol=1e-4, rtol=1e-4)

    print("KERNEL_OK")
</pallas_src>

<mosaic_0001>
module attributes {stable_mosaic.version = 11 : i64} {
  func.func @_bilstm_kernel(%arg0: i32, %arg1: memref<8x2x128xf32, #tpu.memory_space<vmem>>, %arg2: memref<8x2x128xf32, #tpu.memory_space<vmem>>, %arg3: memref<2x32x128xf32, #tpu.memory_space<vmem>>, %arg4: memref<8x2x32xf32, #tpu.memory_space<vmem>>, %arg5: memref<8x2x32xf32, #tpu.memory_space<vmem>>, %arg6: memref<2x2x32xf32, #tpu.memory_space<vmem>>, %arg7: memref<2x2x32xf32, #tpu.memory_space<vmem>>, %arg8: memref<2x32xf32, #tpu.memory_space<vmem>>, %arg9: memref<2x32xf32, #tpu.memory_space<vmem>>, %arg10: memref<2x32xf32, #tpu.memory_space<vmem>>, %arg11: memref<2x32xf32, #tpu.memory_space<vmem>>) attributes {dimension_semantics = [#tpu.dimension_semantics<arbitrary>], iteration_bounds = array<i64: 2>, scalar_prefetch = 0 : i64, scratch_operands = 4 : i64, tpu.core_type = #tpu.core_type<tc>, window_params = [{transform_indices = @transform_0, window_bounds = array<i64: 8, 2, 128>}, {transform_indices = @transform_1, window_bounds = array<i64: 8, 2, 128>}, {pipeline_mode = #tpu.pipeline_mode<synchronous>, transform_indices = @transform_2, window_bounds = array<i64: 2, 32, 128>}, {transform_indices = @transform_3, window_bounds = array<i64: 8, 2, 32>}, {transform_indices = @transform_4, window_bounds = array<i64: 8, 2, 32>}, {pipeline_mode = #tpu.pipeline_mode<synchronous>, transform_indices = @transform_5, window_bounds = array<i64: 2, 2, 32>}, {pipeline_mode = #tpu.pipeline_mode<synchronous>, transform_indices = @transform_6, window_bounds = array<i64: 2, 2, 32>}]} {
    %c0_i32 = arith.constant 0 : i32
    %0 = arith.cmpi eq, %arg0, %c0_i32 : i32
    %1 = arith.extui %0 : i1 to i32
    %c0_i32_0 = arith.constant 0 : i32
    %2 = arith.cmpi ne, %1, %c0_i32_0 : i32
    scf.if %2 {
      %cst_143 = arith.constant 0.000000e+00 : f32
      %386 = vector.broadcast %cst_143 : f32 to vector<2x32xf32>
      %c0_144 = arith.constant 0 : index
      %c0_145 = arith.constant 0 : index
      %387 = vector.load %arg8[%c0_144, %c0_145] : memref<2x32xf32, #tpu.memory_space<vmem>>, vector<2x32xf32>
      tpu.vector_store %arg8[%c0_144, %c0_145], %386 {strides = array<i32>} : memref<2x32xf32, #tpu.memory_space<vmem>>, vector<2x32xf32>,
      %cst_146 = arith.constant 0.000000e+00 : f32
      %388 = vector.broadcast %cst_146 : f32 to vector<2x32xf32>
      %c0_147 = arith.constant 0 : index
      %c0_148 = arith.constant 0 : index
      %389 = vector.load %arg9[%c0_147, %c0_148] : memref<2x32xf32, #tpu.memory_space<vmem>>, vector<2x32xf32>
      tpu.vector_store %arg9[%c0_147, %c0_148], %388 {strides = array<i32>} : memref<2x32xf32, #tpu.memory_space<vmem>>, vector<2x32xf32>,
      %cst_149 = arith.constant 0.000000e+00 : f32
      %390 = vector.broadcast %cst_149 : f32 to vector<2x32xf32>
      %c0_150 = arith.constant 0 : index
      %c0_151 = arith.constant 0 : index
      %391 = vector.load %arg10[%c0_150, %c0_151] : memref<2x32xf32, #tpu.memory_space<vmem>>, vector<2x32xf32>
      tpu.vector_store %arg10[%c0_150, %c0_151], %390 {strides = array<i32>} : memref<2x32xf32, #tpu.memory_space<vmem>>, vector<2x32xf32>,
      %cst_152 = arith.constant 0.000000e+00 : f32
      %392 = vector.broadcast %cst_152 : f32 to vector<2x32xf32>
      %c0_153 = arith.constant 0 : index
      %c0_154 = arith.constant 0 : index
      %393 = vector.load %arg11[%c0_153, %c0_154] : memref<2x32xf32, #tpu.memory_space<vmem>>, vector<2x32xf32>
      tpu.vector_store %arg11[%c0_153, %c0_154], %392 {strides = array<i32>} : memref<2x32xf32, #tpu.memory_space<vmem>>, vector<2x32xf32>,
    } else {
    }
    %c0 = arith.constant 0 : index
    %c0_1 = arith.constant 0 : index
    %c0_2 = arith.constant 0 : index
    %3 = vector.load %arg3[%c0, %c0_1, %c0_2] : memref<2x32x128xf32, #tpu.memory_space<vmem>>, vector<1x32x128xf32>
    %4 = vector.shape_cast %3 : vector<1x32x128xf32> to vector<32x128xf32>
    %c1 = arith.constant 1 : index
    %c0_3 = arith.constant 0 : index
    %c0_4 = arith.constant 0 : index
    %5 = vector.load %arg3[%c1, %c0_3, %c0_4] : memref<2x32x128xf32, #tpu.memory_space<vmem>>, vector<1x32x128xf32>
    %6 = vector.shape_cast %5 : vector<1x32x128xf32> to vector<32x128xf32>
    %c0_5 = arith.constant 0 : index
    %c0_6 = arith.constant 0 : index
    %7 = vector.load %arg8[%c0_5, %c0_6] : memref<2x32xf32, #tpu.memory_space<vmem>>, vector<2x32xf32>
    %c0_7 = arith.constant 0 : index
    %c0_8 = arith.constant 0 : index
    %8 = vector.load %arg9[%c0_7, %c0_8] : memref<2x32xf32, #tpu.memory_space<vmem>>, vector<2x32xf32>
    %c0_9 = arith.constant 0 : index
    %c0_10 = arith.constant 0 : index
    %9 = vector.load %arg10[%c0_9, %c0_10] : memref<2x32xf32, #tpu.memory_space<vmem>>, vector<2x32xf32>
    %c0_11 = arith.constant 0 : index
    %c0_12 = arith.constant 0 : index
    %10 = vector.load %arg11[%c0_11, %c0_12] : memref<2x32xf32, #tpu.memory_space<vmem>>, vector<2x32xf32>
    %c0_13 = arith.constant 0 : index
    %c0_14 = arith.constant 0 : index
    %c0_15 = arith.constant 0 : index
    %11 = vector.load %arg1[%c0_13, %c0_14, %c0_15] : memref<8x2x128xf32, #tpu.memory_space<vmem>>, vector<1x2x128xf32>
    %12 = vector.shape_cast %11 : vector<1x2x128xf32> to vector<2x128xf32>
    %cst = arith.constant dense<0.000000e+00> : vector<2x128xf32>
    %13 = tpu.matmul %7, %4, %cst {dimension_numbers = #tpu.dot_dimension_numbers<[1], [0], [0], [1], [0, 0, 1, 1], [], []>} : vector<2x32xf32>, vector<32x128xf32>, vector<2x128xf32> -> vector<2x128xf32>
    %14 = arith.addf %12, %13 : vector<2x128xf32>
    %15 = vector.extract_strided_slice %14 {offsets = [0, 0], sizes = [2, 96], strides = [1, 1]} : vector<2x128xf32> to vector<2x96xf32>
    %16 = arith.negf %15 : vector<2x96xf32>
    %17 = math.exp %16 : vector<2x96xf32>
    %cst_16 = arith.constant 1.000000e+00 : f32
    %18 = vector.broadcast %cst_16 : f32 to vector<2x96xf32>
    %19 = arith.addf %18, %17 : vector<2x96xf32>
    %20 = arith.divf %18, %19 : vector<2x96xf32>
    %21 = vector.extract_strided_slice %14 {offsets = [0, 96], sizes = [2, 32], strides = [1, 1]} : vector<2x128xf32> to vector<2x32xf32>
    %22 = math.tanh %21 : vector<2x32xf32>
    %23 = vector.extract_strided_slice %20 {offsets = [0, 0], sizes = [2, 32], strides = [1, 1]} : vector<2x96xf32> to vector<2x32xf32>
    %24 = vector.extract_strided_slice %20 {offsets = [0, 32], sizes = [2, 32], strides = [1, 1]} : vector<2x96xf32> to vector<2x32xf32>
    %25 = vector.extract_strided_slice %20 {offsets = [0, 64], sizes = [2, 32], strides = [1, 1]} : vector<2x96xf32> to vector<2x32xf32>
    %26 = arith.mulf %24, %8 : vector<2x32xf32>
    %27 = arith.mulf %23, %22 : vector<2x32xf32>
    %28 = arith.addf %26, %27 : vector<2x32xf32>
    %29 = math.tanh %28 : vector<2x32xf32>
    %30 = arith.mulf %25, %29 : vector<2x32xf32>
    %c0_17 = arith.constant 0 : index
    %c0_18 = arith.constant 0 : index
    %c0_19 = arith.constant 0 : index
    %31 = vector.load %arg4[%c0_17, %c0_18, %c0_19] : memref<8x2x32xf32, #tpu.memory_space<vmem>>, vector<1x2x32xf32>
    %32 = vector.shape_cast %31 : vector<1x2x32xf32> to vector<2x32xf32>
    %33 = vector.shape_cast %30 : vector<2x32xf32> to vector<1x2x32xf32>
    tpu.vector_store %arg4[%c0_17, %c0_18, %c0_19], %33 {strides = array<i32>} : memref<8x2x32xf32, #tpu.memory_space<vmem>>, vector<1x2x32xf32>,
    %c7 = arith.constant 7 : index
    %c0_20 = arith.constant 0 : index
    %c0_21 = arith.constant 0 : index
    %34 = vector.load %arg2[%c7, %c0_20, %c0_21] : memref<8x2x128xf32, #tpu.memory_space<vmem>>, vector<1x2x128xf32>
    %35 = vector.shape_cast %34 : vector<1x2x128xf32> to vector<2x128xf32>
    %cst_22 = arith.constant dense<0.000000e+00> : vector<2x128xf32>
    %36 = tpu.matmul %9, %6, %cst_22 {dimension_numbers = #tpu.dot_dimension_numbers<[1], [0], [0], [1], [0, 0, 1, 1], [], []>} : vector<2x32xf32>, vector<32x128xf32>, vector<2x128xf32> -> vector<2x128xf32>
    %37 = arith.addf %35, %36 : vector<2x128xf32>
    %38 = vector.extract_strided_slice %37 {offsets = [0, 0], sizes = [2, 96], strides = [1, 1]} : vector<2x128xf32> to vector<2x96xf32>
    %39 = arith.negf %38 : vector<2x96xf32>
    %40 = math.exp %39 : vector<2x96xf32>
    %cst_23 = arith.constant 1.000000e+00 : f32
    %41 = vector.broadcast %cst_23 : f32 to vector<2x96xf32>
    %42 = arith.addf %41, %40 : vector<2x96xf32>
    %43 = arith.divf %41, %42 : vector<2x96xf32>
    %44 = vector.extract_strided_slice %37 {offsets = [0, 96], sizes = [2, 32], strides = [1, 1]} : vector<2x128xf32> to vector<2x32xf32>
    %45 = math.tanh %44 : vector<2x32xf32>
    %46 = vector.extract_strided_slice %43 {offsets = [0, 0], sizes = [2, 32], strides = [1, 1]} : vector<2x96xf32> to vector<2x32xf32>
    %47 = vector.extract_strided_slice %43 {offsets = [0, 32], sizes = [2, 32], strides = [1, 1]} : vector<2x96xf32> to vector<2x32xf32>
    %48 = vector.extract_strided_slice %43 {offsets = [0, 64], sizes = [2, 32], strides = [1, 1]} : vector<2x96xf32> to vector<2x32xf32>
    %49 = arith.mulf %47, %10 : vector<2x32xf32>
    %50 = arith.mulf %46, %45 : vector<2x32xf32>
    %51 = arith.addf %49, %50 : vector<2x32xf32>
    %52 = math.tanh %51 : vector<2x32xf32>
    %53 = arith.mulf %48, %52 : vector<2x32xf32>
    %c7_24 = arith.constant 7 : index
    %c0_25 = arith.constant 0 : index
    %c0_26 = arith.constant 0 : index
    %54 = vector.load %arg5[%c7_24, %c0_25, %c0_26] : memref<8x2x32xf32, #tpu.memory_space<vmem>>, vector<1x2x32xf32>
    %55 = vector.shape_cast %54 : vector<1x2x32xf32> to vector<2x32xf32>
    %56 = vector.shape_cast %53 : vector<2x32xf32> to vector<1x2x32xf32>
    tpu.vector_store %arg5[%c7_24, %c0_25, %c0_26], %56 {strides = array<i32>} : memref<8x2x32xf32, #tpu.memory_space<vmem>>, vector<1x2x32xf32>,
    %c1_27 = arith.constant 1 : index
    %c0_28 = arith.constant 0 : index
    %c0_29 = arith.constant 0 : index
    %57 = vector.load %arg1[%c1_27, %c0_28, %c0_29] : memref<8x2x128xf32, #tpu.memory_space<vmem>>, vector<1x2x128xf32>
    %58 = vector.shape_cast %57 : vector<1x2x128xf32> to vector<2x128xf32>
    %cst_30 = arith.constant dense<0.000000e+00> : vector<2x128xf32>
    %59 = tpu.matmul %30, %4, %cst_30 {dimension_numbers = #tpu.dot_dimension_numbers<[1], [0], [0], [1], [0, 0, 1, 1], [], []>} : vector<2x32xf32>, vector<32x128xf32>, vector<2x128xf32> -> vector<2x128xf32>
    %60 = arith.addf %58, %59 : vector<2x128xf32>
    %61 = vector.extract_strided_slice %60 {offsets = [0, 0], sizes = [2, 96], strides = [1, 1]} : vector<2x128xf32> to vector<2x96xf32>
    %62 = arith.negf %61 : vector<2x96xf32>
    %63 = math.exp %62 : vector<2x96xf32>
    %cst_31 = arith.constant 1.000000e+00 : f32
    %64 = vector.broadcast %cst_31 : f32 to vector<2x96xf32>
    %65 = arith.addf %64, %63 : vector<2x96xf32>
    %66 = arith.divf %64, %65 : vector<2x96xf32>
    %67 = vector.extract_strided_slice %60 {offsets = [0, 96], sizes = [2, 32], strides = [1, 1]} : vector<2x128xf32> to vector<2x32xf32>
    %68 = math.tanh %67 : vector<2x32xf32>
    %69 = vector.extract_strided_slice %66 {offsets = [0, 0], sizes = [2, 32], strides = [1, 1]} : vector<2x96xf32> to vector<2x32xf32>
    %70 = vector.extract_strided_slice %66 {offsets = [0, 32], sizes = [2, 32], strides = [1, 1]} : vector<2x96xf32> to vector<2x32xf32>
    %71 = vector.extract_strided_slice %66 {offsets = [0, 64], sizes = [2, 32], strides = [1, 1]} : vector<2x96xf32> to vector<2x32xf32>
    %72 = arith.mulf %70, %28 : vector<2x32xf32>
    %73 = arith.mulf %69, %68 : vector<2x32xf32>
    %74 = arith.addf %72, %73 : vector<2x32xf32>
    %75 = math.tanh %74 : vector<2x32xf32>
    %76 = arith.mulf %71, %75 : vector<2x32xf32>
    %c1_32 = arith.constant 1 : index
    %c0_33 = arith.constant 0 : index
    %c0_34 = arith.constant 0 : index
    %77 = vector.load %arg4[%c1_32, %c0_33, %c0_34] : memref<8x2x32xf32, #tpu.memory_space<vmem>>, vector<1x2x32xf32>
    %78 = vector.shape_cast %77 : vector<1x2x32xf32> to vector<2x32xf32>
    %79 = vector.shape_cast %76 : vector<2x32xf32> to vector<1x2x32xf32>
    tpu.vector_store %arg4[%c1_32, %c0_33, %c0_34], %79 {strides = array<i32>} : memref<8x2x32xf32, #tpu.memory_space<vmem>>, vector<1x2x32xf32>,
    %c6 = arith.constant 6 : index
    %c0_35 = arith.constant 0 : index
    %c0_36 = arith.constant 0 : index
    %80 = vector.load %arg2[%c6, %c0_35, %c0_36] : memref<8x2x128xf32, #tpu.memory_space<vmem>>, vector<1x2x128xf32>
    %81 = vector.shape_cast %80 : vector<1x2x128xf32> to vector<2x128xf32>
    %cst_37 = arith.constant dense<0.000000e+00> : vector<2x128xf32>
    %82 = tpu.matmul %53, %6, %cst_37 {dimension_numbers = #tpu.dot_dimension_numbers<[1], [0], [0], [1], [0, 0, 1, 1], [], []>} : vector<2x32xf32>, vector<32x128xf32>, vector<2x128xf32> -> vector<2x128xf32>
    %83 = arith.addf %81, %82 : vector<2x128xf32>
    %84 = vector.extract_strided_slice %83 {offsets = [0, 0], sizes = [2, 96], strides = [1, 1]} : vector<2x128xf32> to vector<2x96xf32>
    %85 = arith.negf %84 : vector<2x96xf32>
    %86 = math.exp %85 : vector<2x96xf32>
    %cst_38 = arith.constant 1.000000e+00 : f32
    %87 = vector.broadcast %cst_38 : f32 to vector<2x96xf32>
    %88 = arith.addf %87, %86 : vector<2x96xf32>
    %89 = arith.divf %87, %88 : vector<2x96xf32>
    %90 = vector.extract_strided_slice %83 {offsets = [0, 96], sizes = [2, 32], strides = [1, 1]} : vector<2x128xf32> to vector<2x32xf32>
    %91 = math.tanh %90 : vector<2x32xf32>
    %92 = vector.extract_strided_slice %89 {offsets = [0, 0], sizes = [2, 32], strides = [1, 1]} : vector<2x96xf32> to vector<2x32xf32>
    %93 = vector.extract_strided_slice %89 {offsets = [0, 32], sizes = [2, 32], strides = [1, 1]} : vector<2x96xf32> to vector<2x32xf32>
    %94 = vector.extract_strided_slice %89 {offsets = [0, 64], sizes = [2, 32], strides = [1, 1]} : vector<2x96xf32> to vector<2x32xf32>
    %95 = arith.mulf %93, %51 : vector<2x32xf32>
    %96 = arith.mulf %92, %91 : vector<2x32xf32>
    %97 = arith.addf %95, %96 : vector<2x32xf32>
    %98 = math.tanh %97 : vector<2x32xf32>
    %99 = arith.mulf %94, %98 : vector<2x32xf32>
    %c6_39 = arith.constant 6 : index
    %c0_40 = arith.constant 0 : index
    %c0_41 = arith.constant 0 : index
    %100 = vector.load %arg5[%c6_39, %c0_40, %c0_41] : memref<8x2x32xf32, #tpu.memory_space<vmem>>, vector<1x2x32xf32>
    %101 = vector.shape_cast %100 : vector<1x2x32xf32> to vector<2x32xf32>
    %102 = vector.shape_cast %99 : vector<2x32xf32> to vector<1x2x32xf32>
    tpu.vector_store %arg5[%c6_39, %c0_40, %c0_41], %102 {strides = array<i32>} : memref<8x2x32xf32, #tpu.memory_space<vmem>>, vector<1x2x32xf32>,
    %c2 = arith.constant 2 : index
    %c0_42 = arith.constant 0 : index
    %c0_43 = arith.constant 0 : index
    %103 = vector.load %arg1[%c2, %c0_42, %c0_43] : memref<8x2x128xf32, #tpu.memory_space<vmem>>, vector<1x2x128xf32>
    %104 = vector.shape_cast %103 : vector<1x2x128xf32> to vector<2x128xf32>
    %cst_44 = arith.constant dense<0.000000e+00> : vector<2x128xf32>
    %105 = tpu.matmul %76, %4, %cst_44 {dimension_numbers = #tpu.dot_dimension_numbers<[1], [0], [0], [1], [0, 0, 1, 1], [], []>} : vector<2x32xf32>, vector<32x128xf32>, vector<2x128xf32> -> vector<2x128xf32>
    %106 = arith.addf %104, %105 : vector<2x128xf32>
    %107 = vector.extract_strided_slice %106 {offsets = [0, 0], sizes = [2, 96], strides = [1, 1]} : vector<2x128xf32> to vector<2x96xf32>
    %108 = arith.negf %107 : vector<2x96xf32>
    %109 = math.exp %108 : vector<2x96xf32>
    %cst_45 = arith.constant 1.000000e+00 : f32
    %110 = vector.broadcast %cst_45 : f32 to vector<2x96xf32>
    %111 = arith.addf %110, %109 : vector<2x96xf32>
    %112 = arith.divf %110, %111 : vector<2x96xf32>
    %113 = vector.extract_strided_slice %106 {offsets = [0, 96], sizes = [2, 32], strides = [1, 1]} : vector<2x128xf32> to vector<2x32xf32>
    %114 = math.tanh %113 : vector<2x32xf32>
    %115 = vector.extract_strided_slice %112 {offsets = [0, 0], sizes = [2, 32], strides = [1, 1]} : vector<2x96xf32> to vector<2x32xf32>
    %116 = vector.extract_strided_slice %112 {offsets = [0, 32], sizes = [2, 32], strides = [1, 1]} : vector<2x96xf32> to vector<2x32xf32>
    %117 = vector.extract_strided_slice %112 {offsets = [0, 64], sizes = [2, 32], strides = [1, 1]} : vector<2x96xf32> to vector<2x32xf32>
    %118 = arith.mulf %116, %74 : vector<2x32xf32>
    %119 = arith.mulf %115, %114 : vector<2x32xf32>
    %120 = arith.addf %118, %119 : vector<2x32xf32>
    %121 = math.tanh %120 : vector<2x32xf32>
    %122 = arith.mulf %117, %121 : vector<2x32xf32>
    %c2_46 = arith.constant 2 : index
    %c0_47 = arith.constant 0 : index
    %c0_48 = arith.constant 0 : index
    %123 = vector.load %arg4[%c2_46, %c0_47, %c0_48] : memref<8x2x32xf32, #tpu.memory_space<vmem>>, vector<1x2x32xf32>
    %124 = vector.shape_cast %123 : vector<1x2x32xf32> to vector<2x32xf32>
    %125 = vector.shape_cast %122 : vector<2x32xf32> to vector<1x2x32xf32>
    tpu.vector_store %arg4[%c2_46, %c0_47, %c0_48], %125 {strides = array<i32>} : memref<8x2x32xf32, #tpu.memory_space<vmem>>, vector<1x2x32xf32>,
    %c5 = arith.constant 5 : index
    %c0_49 = arith.constant 0 : index
    %c0_50 = arith.constant 0 : index
    %126 = vector.load %arg2[%c5, %c0_49, %c0_50] : memref<8x2x128xf32, #tpu.memory_space<vmem>>, vector<1x2x128xf32>
    %127 = vector.shape_cast %126 : vector<1x2x128xf32> to vector<2x128xf32>
    %cst_51 = arith.constant dense<0.000000e+00> : vector<2x128xf32>
    %128 = tpu.matmul %99, %6, %cst_51 {dimension_numbers = #tpu.dot_dimension_numbers<[1], [0], [0], [1], [0, 0, 1, 1], [], []>} : vector<2x32xf32>, vector<32x128xf32>, vector<2x128xf32> -> vector<2x128xf32>
    %129 = arith.addf %127, %128 : vector<2x128xf32>
    %130 = vector.extract_strided_slice %129 {offsets = [0, 0], sizes = [2, 96], strides = [1, 1]} : vector<2x128xf32> to vector<2x96xf32>
    %131 = arith.negf %130 : vector<2x96xf32>
    %132 = math.exp %131 : vector<2x96xf32>
    %cst_52 = arith.constant 1.000000e+00 : f32
    %133 = vector.broadcast %cst_52 : f32 to vector<2x96xf32>
    %134 = arith.addf %133, %132 : vector<2x96xf32>
    %135 = arith.divf %133, %134 : vector<2x96xf32>
    %136 = vector.extract_strided_slice %129 {offsets = [0, 96], sizes = [2, 32], strides = [1, 1]} : vector<2x128xf32> to vector<2x32xf32>
    %137 = math.tanh %136 : vector<2x32xf32>
    %138 = vector.extract_strided_slice %135 {offsets = [0, 0], sizes = [2, 32], strides = [1, 1]} : vector<2x96xf32> to vector<2x32xf32>
    %139 = vector.extract_strided_slice %135 {offsets = [0, 32], sizes = [2, 32], strides = [1, 1]} : vector<2x96xf32> to vector<2x32xf32>
    %140 = vector.extract_strided_slice %135 {offsets = [0, 64], sizes = [2, 32], strides = [1, 1]} : vector<2x96xf32> to vector<2x32xf32>
    %141 = arith.mulf %139, %97 : vector<2x32xf32>
    %142 = arith.mulf %138, %137 : vector<2x32xf32>
    %143 = arith.addf %141, %142 : vector<2x32xf32>
    %144 = math.tanh %143 : vector<2x32xf32>
    %145 = arith.mulf %140, %144 : vector<2x32xf32>
    %c5_53 = arith.constant 5 : index
    %c0_54 = arith.constant 0 : index
    %c0_55 = arith.constant 0 : index
    %146 = vector.load %arg5[%c5_53, %c0_54, %c0_55] : memref<8x2x32xf32, #tpu.memory_space<vmem>>, vector<1x2x32xf32>
    %147 = vector.shape_cast %146 : vector<1x2x32xf32> to vector<2x32xf32>
    %148 = vector.shape_cast %145 : vector<2x32xf32> to vector<1x2x32xf32>
    tpu.vector_store %arg5[%c5_53, %c0_54, %c0_55], %148 {strides = array<i32>} : memref<8x2x32xf32, #tpu.memory_space<vmem>>, vector<1x2x32xf32>,
    %c3 = arith.constant 3 : index
    %c0_56 = arith.constant 0 : index
    %c0_57 = arith.constant 0 : index
    %149 = vector.load %arg1[%c3, %c0_56, %c0_57] : memref<8x2x128xf32, #tpu.memory_space<vmem>>, vector<1x2x128xf32>
    %150 = vector.shape_cast %149 : vector<1x2x128xf32> to vector<2x128xf32>
    %cst_58 = arith.constant dense<0.000000e+00> : vector<2x128xf32>
    %151 = tpu.matmul %122, %4, %cst_58 {dimension_numbers = #tpu.dot_dimension_numbers<[1], [0], [0], [1], [0, 0, 1, 1], [], []>} : vector<2x32xf32>, vector<32x128xf32>, vector<2x128xf32> -> vector<2x128xf32>
    %152 = arith.addf %150, %151 : vector<2x128xf32>
    %153 = vector.extract_strided_slice %152 {offsets = [0, 0], sizes = [2, 96], strides = [1, 1]} : vector<2x128xf32> to vector<2x96xf32>
    %154 = arith.negf %153 : vector<2x96xf32>
    %155 = math.exp %154 : vector<2x96xf32>
    %cst_59 = arith.constant 1.000000e+00 : f32
    %156 = vector.broadcast %cst_59 : f32 to vector<2x96xf32>
    %157 = arith.addf %156, %155 : vector<2x96xf32>
    %158 = arith.divf %156, %157 : vector<2x96xf32>
    %159 = vector.extract_strided_slice %152 {offsets = [0, 96], sizes = [2, 32], strides = [1, 1]} : vector<2x128xf32> to vector<2x32xf32>
    %160 = math.tanh %159 : vector<2x32xf32>
    %161 = vector.extract_strided_slice %158 {offsets = [0, 0], sizes = [2, 32], strides = [1, 1]} : vector<2x96xf32> to vector<2x32xf32>
    %162 = vector.extract_strided_slice %158 {offsets = [0, 32], sizes = [2, 32], strides = [1, 1]} : vector<2x96xf32> to vector<2x32xf32>
    %163 = vector.extract_strided_slice %158 {offsets = [0, 64], sizes = [2, 32], strides = [1, 1]} : vector<2x96xf32> to vector<2x32xf32>
    %164 = arith.mulf %162, %120 : vector<2x32xf32>
    %165 = arith.mulf %161, %160 : vector<2x32xf32>
    %166 = arith.addf %164, %165 : vector<2x32xf32>
    %167 = math.tanh %166 : vector<2x32xf32>
    %168 = arith.mulf %163, %167 : vector<2x32xf32>
    %c3_60 = arith.constant 3 : index
    %c0_61 = arith.constant 0 : index
    %c0_62 = arith.constant 0 : index
    %169 = vector.load %arg4[%c3_60, %c0_61, %c0_62] : memref<8x2x32xf32, #tpu.memory_space<vmem>>, vector<1x2x32xf32>
    %170 = vector.shape_cast %169 : vector<1x2x32xf32> to vector<2x32xf32>
    %171 = vector.shape_cast %168 : vector<2x32xf32> to vector<1x2x32xf32>
    tpu.vector_store %arg4[%c3_60, %c0_61, %c0_62], %171 {strides = array<i32>} : memref<8x2x32xf32, #tpu.memory_space<vmem>>, vector<1x2x32xf32>,
    %c4 = arith.constant 4 : index
    %c0_63 = arith.constant 0 : index
    %c0_64 = arith.constant 0 : index
    %172 = vector.load %arg2[%c4, %c0_63, %c0_64] : memref<8x2x128xf32, #tpu.memory_space<vmem>>, vector<1x2x128xf32>
    %173 = vector.shape_cast %172 : vector<1x2x128xf32> to vector<2x128xf32>
    %cst_65 = arith.constant dense<0.000000e+00> : vector<2x128xf32>
    %174 = tpu.matmul %145, %6, %cst_65 {dimension_numbers = #tpu.dot_dimension_numbers<[1], [0], [0], [1], [0, 0, 1, 1], [], []>} : vector<2x32xf32>, vector<32x128xf32>, vector<2x128xf32> -> vector<2x128xf32>
    %175 = arith.addf %173, %174 : vector<2x128xf32>
    %176 = vector.extract_strided_slice %175 {offsets = [0, 0], sizes = [2, 96], strides = [1, 1]} : vector<2x128xf32> to vector<2x96xf32>
    %177 = arith.negf %176 : vector<2x96xf32>
    %178 = math.exp %177 : vector<2x96xf32>
    %cst_66 = arith.constant 1.000000e+00 : f32
    %179 = vector.broadcast %cst_66 : f32 to vector<2x96xf32>
    %180 = arith.addf %179, %178 : vector<2x96xf32>
    %181 = arith.divf %179, %180 : vector<2x96xf32>
    %182 = vector.extract_strided_slice %175 {offsets = [0, 96], sizes = [2, 32], strides = [1, 1]} : vector<2x128xf32> to vector<2x32xf32>
    %183 = math.tanh %182 : vector<2x32xf32>
    %184 = vector.extract_strided_slice %181 {offsets = [0, 0], sizes = [2, 32], strides = [1, 1]} : vector<2x96xf32> to vector<2x32xf32>
    %185 = vector.extract_strided_slice %181 {offsets = [0, 32], sizes = [2, 32], strides = [1, 1]} : vector<2x96xf32> to vector<2x32xf32>
    %186 = vector.extract_strided_slice %181 {offsets = [0, 64], sizes = [2, 32], strides = [1, 1]} : vector<2x96xf32> to vector<2x32xf32>
    %187 = arith.mulf %185, %143 : vector<2x32xf32>
    %188 = arith.mulf %184, %183 : vector<2x32xf32>
    %189 = arith.addf %187, %188 : vector<2x32xf32>
    %190 = math.tanh %189 : vector<2x32xf32>
    %191 = arith.mulf %186, %190 : vector<2x32xf32>
    %c4_67 = arith.constant 4 : index
    %c0_68 = arith.constant 0 : index
    %c0_69 = arith.constant 0 : index
    %192 = vector.load %arg5[%c4_67, %c0_68, %c0_69] : memref<8x2x32xf32, #tpu.memory_space<vmem>>, vector<1x2x32xf32>
    %193 = vector.shape_cast %192 : vector<1x2x32xf32> to vector<2x32xf32>
    %194 = vector.shape_cast %191 : vector<2x32xf32> to vector<1x2x32xf32>
    tpu.vector_store %arg5[%c4_67, %c0_68, %c0_69], %194 {strides = array<i32>} : memref<8x2x32xf32, #tpu.memory_space<vmem>>, vector<1x2x32xf32>,
    %c4_70 = arith.constant 4 : index
    %c0_71 = arith.constant 0 : index
    %c0_72 = arith.constant 0 : index
    %195 = vector.load %arg1[%c4_70, %c0_71, %c0_72] : memref<8x2x128xf32, #tpu.memory_space<vmem>>, vector<1x2x128xf32>
    %196 = vector.shape_cast %195 : vector<1x2x128xf32> to vector<2x128xf32>
    %cst_73 = arith.constant dense<0.000000e+00> : vector<2x128xf32>
    %197 = tpu.matmul %168, %4, %cst_73 {dimension_numbers = #tpu.dot_dimension_numbers<[1], [0], [0], [1], [0, 0, 1, 1], [], []>} : vector<2x32xf32>, vector<32x128xf32>, vector<2x128xf32> -> vector<2x128xf32>
    %198 = arith.addf %196, %197 : vector<2x128xf32>
    %199 = vector.extract_strided_slice %198 {offsets = [0, 0], sizes = [2, 96], strides = [1, 1]} : vector<2x128xf32> to vector<2x96xf32>
    %200 = arith.negf %199 : vector<2x96xf32>
    %201 = math.exp %200 : vector<2x96xf32>
    %cst_74 = arith.constant 1.000000e+00 : f32
    %202 = vector.broadcast %cst_74 : f32 to vector<2x96xf32>
    %203 = arith.addf %202, %201 : vector<2x96xf32>
    %204 = arith.divf %202, %203 : vector<2x96xf32>
    %205 = vector.extract_strided_slice %198 {offsets = [0, 96], sizes = [2, 32], strides = [1, 1]} : vector<2x128xf32> to vector<2x32xf32>
    %206 = math.tanh %205 : vector<2x32xf32>
    %207 = vector.extract_strided_slice %204 {offsets = [0, 0], sizes = [2, 32], strides = [1, 1]} : vector<2x96xf32> to vector<2x32xf32>
    %208 = vector.extract_strided_slice %204 {offsets = [0, 32], sizes = [2, 32], strides = [1, 1]} : vector<2x96xf32> to vector<2x32xf32>
    %209 = vector.extract_strided_slice %204 {offsets = [0, 64], sizes = [2, 32], strides = [1, 1]} : vector<2x96xf32> to vector<2x32xf32>
    %210 = arith.mulf %208, %166 : vector<2x32xf32>
    %211 = arith.mulf %207, %206 : vector<2x32xf32>
    %212 = arith.addf %210, %211 : vector<2x32xf32>
    %213 = math.tanh %212 : vector<2x32xf32>
    %214 = arith.mulf %209, %213 : vector<2x32xf32>
    %c4_75 = arith.constant 4 : index
    %c0_76 = arith.constant 0 : index
    %c0_77 = arith.constant 0 : index
    %215 = vector.load %arg4[%c4_75, %c0_76, %c0_77] : memref<8x2x32xf32, #tpu.memory_space<vmem>>, vector<1x2x32xf32>
    %216 = vector.shape_cast %215 : vector<1x2x32xf32> to vector<2x32xf32>
    %217 = vector.shape_cast %214 : vector<2x32xf32> to vector<1x2x32xf32>
    tpu.vector_store %arg4[%c4_75, %c0_76, %c0_77], %217 {strides = array<i32>} : memref<8x2x32xf32, #tpu.memory_space<vmem>>, vector<1x2x32xf32>,
    %c3_78 = arith.constant 3 : index
    %c0_79 = arith.constant 0 : index
    %c0_80 = arith.constant 0 : index
    %218 = vector.load %arg2[%c3_78, %c0_79, %c0_80] : memref<8x2x128xf32, #tpu.memory_space<vmem>>, vector<1x2x128xf32>
    %219 = vector.shape_cast %218 : vector<1x2x128xf32> to vector<2x128xf32>
    %cst_81 = arith.constant dense<0.000000e+00> : vector<2x128xf32>
    %220 = tpu.matmul %191, %6, %cst_81 {dimension_numbers = #tpu.dot_dimension_numbers<[1], [0], [0], [1], [0, 0, 1, 1], [], []>} : vector<2x32xf32>, vector<32x128xf32>, vector<2x128xf32> -> vector<2x128xf32>
    %221 = arith.addf %219, %220 : vector<2x128xf32>
    %222 = vector.extract_strided_slice %221 {offsets = [0, 0], sizes = [2, 96], strides = [1, 1]} : vector<2x128xf32> to vector<2x96xf32>
    %223 = arith.negf %222 : vector<2x96xf32>
    %224 = math.exp %223 : vector<2x96xf32>
    %cst_82 = arith.constant 1.000000e+00 : f32
    %225 = vector.broadcast %cst_82 : f32 to vector<2x96xf32>
    %226 = arith.addf %225, %224 : vector<2x96xf32>
    %227 = arith.divf %225, %226 : vector<2x96xf32>
    %228 = vector.extract_strided_slice %221 {offsets = [0, 96], sizes = [2, 32], strides = [1, 1]} : vector<2x128xf32> to vector<2x32xf32>
    %229 = math.tanh %228 : vector<2x32xf32>
    %230 = vector.extract_strided_slice %227 {offsets = [0, 0], sizes = [2, 32], strides = [1, 1]} : vector<2x96xf32> to vector<2x32xf32>
    %231 = vector.extract_strided_slice %227 {offsets = [0, 32], sizes = [2, 32], strides = [1, 1]} : vector<2x96xf32> to vector<2x32xf32>
    %232 = vector.extract_strided_slice %227 {offsets = [0, 64], sizes = [2, 32], strides = [1, 1]} : vector<2x96xf32> to vector<2x32xf32>
    %233 = arith.mulf %231, %189 : vector<2x32xf32>
    %234 = arith.mulf %230, %229 : vector<2x32xf32>
    %235 = arith.addf %233, %234 : vector<2x32xf32>
    %236 = math.tanh %235 : vector<2x32xf32>
    %237 = arith.mulf %232, %236 : vector<2x32xf32>
    %c3_83 = arith.constant 3 : index
    %c0_84 = arith.constant 0 : index
    %c0_85 = arith.constant 0 : index
    %238 = vector.load %arg5[%c3_83, %c0_84, %c0_85] : memref<8x2x32xf32, #tpu.memory_space<vmem>>, vector<1x2x32xf32>
    %239 = vector.shape_cast %238 : vector<1x2x32xf32> to vector<2x32xf32>
    %240 = vector.shape_cast %237 : vector<2x32xf32> to vector<1x2x32xf32>
    tpu.vector_store %arg5[%c3_83, %c0_84, %c0_85], %240 {strides = array<i32>} : memref<8x2x32xf32, #tpu.memory_space<vmem>>, vector<1x2x32xf32>,
    %c5_86 = arith.constant 5 : index
    %c0_87 = arith.constant 0 : index
    %c0_88 = arith.constant 0 : index
    %241 = vector.load %arg1[%c5_86, %c0_87, %c0_88] : memref<8x2x128xf32, #tpu.memory_space<vmem>>, vector<1x2x128xf32>
    %242 = vector.shape_cast %241 : vector<1x2x128xf32> to vector<2x128xf32>
    %cst_89 = arith.constant dense<0.000000e+00> : vector<2x128xf32>
    %243 = tpu.matmul %214, %4, %cst_89 {dimension_numbers = #tpu.dot_dimension_numbers<[1], [0], [0], [1], [0, 0, 1, 1], [], []>} : vector<2x32xf32>, vector<32x128xf32>, vector<2x128xf32> -> vector<2x128xf32>
    %244 = arith.addf %242, %243 : vector<2x128xf32>
    %245 = vector.extract_strided_slice %244 {offsets = [0, 0], sizes = [2, 96], strides = [1, 1]} : vector<2x128xf32> to vector<2x96xf32>
    %246 = arith.negf %245 : vector<2x96xf32>
    %247 = math.exp %246 : vector<2x96xf32>
    %cst_90 = arith.constant 1.000000e+00 : f32
    %248 = vector.broadcast %cst_90 : f32 to vector<2x96xf32>
    %249 = arith.addf %248, %247 : vector<2x96xf32>
    %250 = arith.divf %248, %249 : vector<2x96xf32>
    %251 = vector.extract_strided_slice %244 {offsets = [0, 96], sizes = [2, 32], strides = [1, 1]} : vector<2x128xf32> to vector<2x32xf32>
    %252 = math.tanh %251 : vector<2x32xf32>
    %253 = vector.extract_strided_slice %250 {offsets = [0, 0], sizes = [2, 32], strides = [1, 1]} : vector<2x96xf32> to vector<2x32xf32>
    %254 = vector.extract_strided_slice %250 {offsets = [0, 32], sizes = [2, 32], strides = [1, 1]} : vector<2x96xf32> to vector<2x32xf32>
    %255 = vector.extract_strided_slice %250 {offsets = [0, 64], sizes = [2, 32], strides = [1, 1]} : vector<2x96xf32> to vector<2x32xf32>
    %256 = arith.mulf %254, %212 : vector<2x32xf32>
    %257 = arith.mulf %253, %252 : vector<2x32xf32>
    %258 = arith.addf %256, %257 : vector<2x32xf32>
    %259 = math.tanh %258 : vector<2x32xf32>
    %260 = arith.mulf %255, %259 : vector<2x32xf32>
    %c5_91 = arith.constant 5 : index
    %c0_92 = arith.constant 0 : index
    %c0_93 = arith.constant 0 : index
    %261 = vector.load %arg4[%c5_91, %c0_92, %c0_93] : memref<8x2x32xf32, #tpu.memory_space<vmem>>, vector<1x2x32xf32>
    %262 = vector.shape_cast %261 : vector<1x2x32xf32> to vector<2x32xf32>
    %263 = vector.shape_cast %260 : vector<2x32xf32> to vector<1x2x32xf32>
    tpu.vector_store %arg4[%c5_91, %c0_92, %c0_93], %263 {strides = array<i32>} : memref<8x2x32xf32, #tpu.memory_space<vmem>>, vector<1x2x32xf32>,
    %c2_94 = arith.constant 2 : index
    %c0_95 = arith.constant 0 : index
    %c0_96 = arith.constant 0 : index
    %264 = vector.load %arg2[%c2_94, %c0_95, %c0_96] : memref<8x2x128xf32, #tpu.memory_space<vmem>>, vector<1x2x128xf32>
    %265 = vector.shape_cast %264 : vector<1x2x128xf32> to vector<2x128xf32>
    %cst_97 = arith.constant dense<0.000000e+00> : vector<2x128xf32>
    %266 = tpu.matmul %237, %6, %cst_97 {dimension_numbers = #tpu.dot_dimension_numbers<[1], [0], [0], [1], [0, 0, 1, 1], [], []>} : vector<2x32xf32>, vector<32x128xf32>, vector<2x128xf32> -> vector<2x128xf32>
    %267 = arith.addf %265, %266 : vector<2x128xf32>
    %268 = vector.extract_strided_slice %267 {offsets = [0, 0], sizes = [2, 96], strides = [1, 1]} : vector<2x128xf32> to vector<2x96xf32>
    %269 = arith.negf %268 : vector<2x96xf32>
    %270 = math.exp %269 : vector<2x96xf32>
    %cst_98 = arith.constant 1.000000e+00 : f32
    %271 = vector.broadcast %cst_98 : f32 to vector<2x96xf32>
    %272 = arith.addf %271, %270 : vector<2x96xf32>
    %273 = arith.divf %271, %272 : vector<2x96xf32>
    %274 = vector.extract_strided_slice %267 {offsets = [0, 96], sizes = [2, 32], strides = [1, 1]} : vector<2x128xf32> to vector<2x32xf32>
    %275 = math.tanh %274 : vector<2x32xf32>
    %276 = vector.extract_strided_slice %273 {offsets = [0, 0], sizes = [2, 32], strides = [1, 1]} : vector<2x96xf32> to vector<2x32xf32>
    %277 = vector.extract_strided_slice %273 {offsets = [0, 32], sizes = [2, 32], strides = [1, 1]} : vector<2x96xf32> to vector<2x32xf32>
    %278 = vector.extract_strided_slice %273 {offsets = [0, 64], sizes = [2, 32], strides = [1, 1]} : vector<2x96xf32> to vector<2x32xf32>
    %279 = arith.mulf %277, %235 : vector<2x32xf32>
    %280 = arith.mulf %276, %275 : vector<2x32xf32>
    %281 = arith.addf %279, %280 : vector<2x32xf32>
    %282 = math.tanh %281 : vector<2x32xf32>
    %283 = arith.mulf %278, %282 : vector<2x32xf32>
    %c2_99 = arith.constant 2 : index
    %c0_100 = arith.constant 0 : index
    %c0_101 = arith.constant 0 : index
    %284 = vector.load %arg5[%c2_99, %c0_100, %c0_101] : memref<8x2x32xf32, #tpu.memory_space<vmem>>, vector<1x2x32xf32>
    %285 = vector.shape_cast %284 : vector<1x2x32xf32> to vector<2x32xf32>
    %286 = vector.shape_cast %283 : vector<2x32xf32> to vector<1x2x32xf32>
    tpu.vector_store %arg5[%c2_99, %c0_100, %c0_101], %286 {strides = array<i32>} : memref<8x2x32xf32, #tpu.memory_space<vmem>>, vector<1x2x32xf32>,
    %c6_102 = arith.constant 6 : index
    %c0_103 = arith.constant 0 : index
    %c0_104 = arith.constant 0 : index
    %287 = vector.load %arg1[%c6_102, %c0_103, %c0_104] : memref<8x2x128xf32, #tpu.memory_space<vmem>>, vector<1x2x128xf32>
    %288 = vector.shape_cast %287 : vector<1x2x128xf32> to vector<2x128xf32>
    %cst_105 = arith.constant dense<0.000000e+00> : vector<2x128xf32>
    %289 = tpu.matmul %260, %4, %cst_105 {dimension_numbers = #tpu.dot_dimension_numbers<[1], [0], [0], [1], [0, 0, 1, 1], [], []>} : vector<2x32xf32>, vector<32x128xf32>, vector<2x128xf32> -> vector<2x128xf32>
    %290 = arith.addf %288, %289 : vector<2x128xf32>
    %291 = vector.extract_strided_slice %290 {offsets = [0, 0], sizes = [2, 96], strides = [1, 1]} : vector<2x128xf32> to vector<2x96xf32>
    %292 = arith.negf %291 : vector<2x96xf32>
    %293 = math.exp %292 : vector<2x96xf32>
    %cst_106 = arith.constant 1.000000e+00 : f32
    %294 = vector.broadcast %cst_106 : f32 to vector<2x96xf32>
    %295 = arith.addf %294, %293 : vector<2x96xf32>
    %296 = arith.divf %294, %295 : vector<2x96xf32>
    %297 = vector.extract_strided_slice %290 {offsets = [0, 96], sizes = [2, 32], strides = [1, 1]} : vector<2x128xf32> to vector<2x32xf32>
    %298 = math.tanh %297 : vector<2x32xf32>
    %299 = vector.extract_strided_slice %296 {offsets = [0, 0], sizes = [2, 32], strides = [1, 1]} : vector<2x96xf32> to vector<2x32xf32>
    %300 = vector.extract_strided_slice %296 {offsets = [0, 32], sizes = [2, 32], strides = [1, 1]} : vector<2x96xf32> to vector<2x32xf32>
    %301 = vector.extract_strided_slice %296 {offsets = [0, 64], sizes = [2, 32], strides = [1, 1]} : vector<2x96xf32> to vector<2x32xf32>
    %302 = arith.mulf %300, %258 : vector<2x32xf32>
    %303 = arith.mulf %299, %298 : vector<2x32xf32>
    %304 = arith.addf %302, %303 : vector<2x32xf32>
    %305 = math.tanh %304 : vector<2x32xf32>
    %306 = arith.mulf %301, %305 : vector<2x32xf32>
    %c6_107 = arith.constant 6 : index
    %c0_108 = arith.constant 0 : index
    %c0_109 = arith.constant 0 : index
    %307 = vector.load %arg4[%c6_107, %c0_108, %c0_109] : memref<8x2x32xf32, #tpu.memory_space<vmem>>, vector<1x2x32xf32>
    %308 = vector.shape_cast %307 : vector<1x2x32xf32> to vector<2x32xf32>
    %309 = vector.shape_cast %306 : vector<2x32xf32> to vector<1x2x32xf32>
    tpu.vector_store %arg4[%c6_107, %c0_108, %c0_109], %309 {strides = array<i32>} : memref<8x2x32xf32, #tpu.memory_space<vmem>>, vector<1x2x32xf32>,
    %c1_110 = arith.constant 1 : index
    %c0_111 = arith.constant 0 : index
    %c0_112 = arith.constant 0 : index
    %310 = vector.load %arg2[%c1_110, %c0_111, %c0_112] : memref<8x2x128xf32, #tpu.memory_space<vmem>>, vector<1x2x128xf32>
    %311 = vector.shape_cast %310 : vector<1x2x128xf32> to vector<2x128xf32>
    %cst_113 = arith.constant dense<0.000000e+00> : vector<2x128xf32>
    %312 = tpu.matmul %283, %6, %cst_113 {dimension_numbers = #tpu.dot_dimension_numbers<[1], [0], [0], [1], [0, 0, 1, 1], [], []>} : vector<2x32xf32>, vector<32x128xf32>, vector<2x128xf32> -> vector<2x128xf32>
    %313 = arith.addf %311, %312 : vector<2x128xf32>
    %314 = vector.extract_strided_slice %313 {offsets = [0, 0], sizes = [2, 96], strides = [1, 1]} : vector<2x128xf32> to vector<2x96xf32>
    %315 = arith.negf %314 : vector<2x96xf32>
    %316 = math.exp %315 : vector<2x96xf32>
    %cst_114 = arith.constant 1.000000e+00 : f32
    %317 = vector.broadcast %cst_114 : f32 to vector<2x96xf32>
    %318 = arith.addf %317, %316 : vector<2x96xf32>
    %319 = arith.divf %317, %318 : vector<2x96xf32>
    %320 = vector.extract_strided_slice %313 {offsets = [0, 96], sizes = [2, 32], strides = [1, 1]} : vector<2x128xf32> to vector<2x32xf32>
    %321 = math.tanh %320 : vector<2x32xf32>
    %322 = vector.extract_strided_slice %319 {offsets = [0, 0], sizes = [2, 32], strides = [1, 1]} : vector<2x96xf32> to vector<2x32xf32>
    %323 = vector.extract_strided_slice %319 {offsets = [0, 32], sizes = [2, 32], strides = [1, 1]} : vector<2x96xf32> to vector<2x32xf32>
    %324 = vector.extract_strided_slice %319 {offsets = [0, 64], sizes = [2, 32], strides = [1, 1]} : vector<2x96xf32> to vector<2x32xf32>
    %325 = arith.mulf %323, %281 : vector<2x32xf32>
    %326 = arith.mulf %322, %321 : vector<2x32xf32>
    %327 = arith.addf %325, %326 : vector<2x32xf32>
    %328 = math.tanh %327 : vector<2x32xf32>
    %329 = arith.mulf %324, %328 : vector<2x32xf32>
    %c1_115 = arith.constant 1 : index
    %c0_116 = arith.constant 0 : index
    %c0_117 = arith.constant 0 : index
    %330 = vector.load %arg5[%c1_115, %c0_116, %c0_117] : memref<8x2x32xf32, #tpu.memory_space<vmem>>, vector<1x2x32xf32>
    %331 = vector.shape_cast %330 : vector<1x2x32xf32> to vector<2x32xf32>
    %332 = vector.shape_cast %329 : vector<2x32xf32> to vector<1x2x32xf32>
    tpu.vector_store %arg5[%c1_115, %c0_116, %c0_117], %332 {strides = array<i32>} : memref<8x2x32xf32, #tpu.memory_space<vmem>>, vector<1x2x32xf32>,
    %c7_118 = arith.constant 7 : index
    %c0_119 = arith.constant 0 : index
    %c0_120 = arith.constant 0 : index
    %333 = vector.load %arg1[%c7_118, %c0_119, %c0_120] : memref<8x2x128xf32, #tpu.memory_space<vmem>>, vector<1x2x128xf32>
    %334 = vector.shape_cast %333 : vector<1x2x128xf32> to vector<2x128xf32>
    %cst_121 = arith.constant dense<0.000000e+00> : vector<2x128xf32>
    %335 = tpu.matmul %306, %4, %cst_121 {dimension_numbers = #tpu.dot_dimension_numbers<[1], [0], [0], [1], [0, 0, 1, 1], [], []>} : vector<2x32xf32>, vector<32x128xf32>, vector<2x128xf32> -> vector<2x128xf32>
    %336 = arith.addf %334, %335 : vector<2x128xf32>
    %337 = vector.extract_strided_slice %336 {offsets = [0, 0], sizes = [2, 96], strides = [1, 1]} : vector<2x128xf32> to vector<2x96xf32>
    %338 = arith.negf %337 : vector<2x96xf32>
    %339 = math.exp %338 : vector<2x96xf32>
    %cst_122 = arith.constant 1.000000e+00 : f32
    %340 = vector.broadcast %cst_122 : f32 to vector<2x96xf32>
    %341 = arith.addf %340, %339 : vector<2x96xf32>
    %342 = arith.divf %340, %341 : vector<2x96xf32>
    %343 = vector.extract_strided_slice %336 {offsets = [0, 96], sizes = [2, 32], strides = [1, 1]} : vector<2x128xf32> to vector<2x32xf32>
    %344 = math.tanh %343 : vector<2x32xf32>
    %345 = vector.extract_strided_slice %342 {offsets = [0, 0], sizes = [2, 32], strides = [1, 1]} : vector<2x96xf32> to vector<2x32xf32>
    %346 = vector.extract_strided_slice %342 {offsets = [0, 32], sizes = [2, 32], strides = [1, 1]} : vector<2x96xf32> to vector<2x32xf32>
    %347 = vector.extract_strided_slice %342 {offsets = [0, 64], sizes = [2, 32], strides = [1, 1]} : vector<2x96xf32> to vector<2x32xf32>
    %348 = arith.mulf %346, %304 : vector<2x32xf32>
    %349 = arith.mulf %345, %344 : vector<2x32xf32>
    %350 = arith.addf %348, %349 : vector<2x32xf32>
    %351 = math.tanh %350 : vector<2x32xf32>
    %352 = arith.mulf %347, %351 : vector<2x32xf32>
    %c7_123 = arith.constant 7 : index
    %c0_124 = arith.constant 0 : index
    %c0_125 = arith.constant 0 : index
    %353 = vector.load %arg4[%c7_123, %c0_124, %c0_125] : memref<8x2x32xf32, #tpu.memory_space<vmem>>, vector<1x2x32xf32>
    %354 = vector.shape_cast %353 : vector<1x2x32xf32> to vector<2x32xf32>
    %355 = vector.shape_cast %352 : vector<2x32xf32> to vector<1x2x32xf32>
    tpu.vector_store %arg4[%c7_123, %c0_124, %c0_125], %355 {strides = array<i32>} : memref<8x2x32xf32, #tpu.memory_space<vmem>>, vector<1x2x32xf32>,
    %c0_126 = arith.constant 0 : index
    %c0_127 = arith.constant 0 : index
    %c0_128 = arith.constant 0 : index
    %356 = vector.load %arg2[%c0_126, %c0_127, %c0_128] : memref<8x2x128xf32, #tpu.memory_space<vmem>>, vector<1x2x128xf32>
    %357 = vector.shape_cast %356 : vector<1x2x128xf32> to vector<2x128xf32>
    %cst_129 = arith.constant dense<0.000000e+00> : vector<2x128xf32>
    %358 = tpu.matmul %329, %6, %cst_129 {dimension_numbers = #tpu.dot_dimension_numbers<[1], [0], [0], [1], [0, 0, 1, 1], [], []>} : vector<2x32xf32>, vector<32x128xf32>, vector<2x128xf32> -> vector<2x128xf32>
    %359 = arith.addf %357, %358 : vector<2x128xf32>
    %360 = vector.extract_strided_slice %359 {offsets = [0, 0], sizes = [2, 96], strides = [1, 1]} : vector<2x128xf32> to vector<2x96xf32>
    %361 = arith.negf %360 : vector<2x96xf32>
    %362 = math.exp %361 : vector<2x96xf32>
    %cst_130 = arith.constant 1.000000e+00 : f32
    %363 = vector.broadcast %cst_130 : f32 to vector<2x96xf32>
    %364 = arith.addf %363, %362 : vector<2x96xf32>
    %365 = arith.divf %363, %364 : vector<2x96xf32>
    %366 = vector.extract_strided_slice %359 {offsets = [0, 96], sizes = [2, 32], strides = [1, 1]} : vector<2x128xf32> to vector<2x32xf32>
    %367 = math.tanh %366 : vector<2x32xf32>
    %368 = vector.extract_strided_slice %365 {offsets = [0, 0], sizes = [2, 32], strides = [1, 1]} : vector<2x96xf32> to vector<2x32xf32>
    %369 = vector.extract_strided_slice %365 {offsets = [0, 32], sizes = [2, 32], strides = [1, 1]} : vector<2x96xf32> to vector<2x32xf32>
    %370 = vector.extract_strided_slice %365 {offsets = [0, 64], sizes = [2, 32], strides = [1, 1]} : vector<2x96xf32> to vector<2x32xf32>
    %371 = arith.mulf %369, %327 : vector<2x32xf32>
    %372 = arith.mulf %368, %367 : vector<2x32xf32>
    %373 = arith.addf %371, %372 : vector<2x32xf32>
    %374 = math.tanh %373 : vector<2x32xf32>
    %375 = arith.mulf %370, %374 : vector<2x32xf32>
    %c0_131 = arith.constant 0 : index
    %c0_132 = arith.constant 0 : index
    %c0_133 = arith.constant 0 : index
    %376 = vector.load %arg5[%c0_131, %c0_132, %c0_133] : memref<8x2x32xf32, #tpu.memory_space<vmem>>, vector<1x2x32xf32>
    %377 = vector.shape_cast %376 : vector<1x2x32xf32> to vector<2x32xf32>
    %378 = vector.shape_cast %375 : vector<2x32xf32> to vector<1x2x32xf32>
    tpu.vector_store %arg5[%c0_131, %c0_132, %c0_133], %378 {strides = array<i32>} : memref<8x2x32xf32, #tpu.memory_space<vmem>>, vector<1x2x32xf32>,
    %c0_134 = arith.constant 0 : index
    %c0_135 = arith.constant 0 : index
    %379 = vector.load %arg8[%c0_134, %c0_135] : memref<2x32xf32, #tpu.memory_space<vmem>>, vector<2x32xf32>
    tpu.vector_store %arg8[%c0_134, %c0_135], %352 {strides = array<i32>} : memref<2x32xf32, #tpu.memory_space<vmem>>, vector<2x32xf32>,
    %c0_136 = arith.constant 0 : index
    %c0_137 = arith.constant 0 : index
    %380 = vector.load %arg9[%c0_136, %c0_137] : memref<2x32xf32, #tpu.memory_space<vmem>>, vector<2x32xf32>
    tpu.vector_store %arg9[%c0_136, %c0_137], %350 {strides = array<i32>} : memref<2x32xf32, #tpu.memory_space<vmem>>, vector<2x32xf32>,
    %c0_138 = arith.constant 0 : index
    %c0_139 = arith.constant 0 : index
    %381 = vector.load %arg10[%c0_138, %c0_139] : memref<2x32xf32, #tpu.memory_space<vmem>>, vector<2x32xf32>
    tpu.vector_store %arg10[%c0_138, %c0_139], %375 {strides = array<i32>} : memref<2x32xf32, #tpu.memory_space<vmem>>, vector<2x32xf32>,
    %c0_140 = arith.constant 0 : index
    %c0_141 = arith.constant 0 : index
    %382 = vector.load %arg11[%c0_140, %c0_141] : memref<2x32xf32, #tpu.memory_space<vmem>>, vector<2x32xf32>
    tpu.vector_store %arg11[%c0_140, %c0_141], %373 {strides = array<i32>} : memref<2x32xf32, #tpu.memory_space<vmem>>, vector<2x32xf32>,
    %c1_i32 = arith.constant 1 : i32
    %383 = arith.cmpi eq, %arg0, %c1_i32 : i32
    %384 = arith.extui %383 : i1 to i32
    %c0_i32_142 = arith.constant 0 : i32
    %385 = arith.cmpi ne, %384, %c0_i32_142 : i32
    scf.if %385 {
      %c0_143 = arith.constant 0 : index
      %c0_144 = arith.constant 0 : index
      %c0_145 = arith.constant 0 : index
      %386 = vector.load %arg6[%c0_143, %c0_144, %c0_145] : memref<2x2x32xf32, #tpu.memory_space<vmem>>, vector<1x2x32xf32>
      %387 = vector.shape_cast %386 : vector<1x2x32xf32> to vector<2x32xf32>
      %388 = vector.shape_cast %352 : vector<2x32xf32> to vector<1x2x32xf32>
      tpu.vector_store %arg6[%c0_143, %c0_144, %c0_145], %388 {strides = array<i32>} : memref<2x2x32xf32, #tpu.memory_space<vmem>>, vector<1x2x32xf32>,
      %c1_146 = arith.constant 1 : index
      %c0_147 = arith.constant 0 : index
      %c0_148 = arith.constant 0 : index
      %389 = vector.load %arg6[%c1_146, %c0_147, %c0_148] : memref<2x2x32xf32, #tpu.memory_space<vmem>>, vector<1x2x32xf32>
      %390 = vector.shape_cast %389 : vector<1x2x32xf32> to vector<2x32xf32>
      %391 = vector.shape_cast %375 : vector<2x32xf32> to vector<1x2x32xf32>
      tpu.vector_store %arg6[%c1_146, %c0_147, %c0_148], %391 {strides = array<i32>} : memref<2x2x32xf32, #tpu.memory_space<vmem>>, vector<1x2x32xf32>,
      %c0_149 = arith.constant 0 : index
      %c0_150 = arith.constant 0 : index
      %c0_151 = arith.constant 0 : index
      %392 = vector.load %arg7[%c0_149, %c0_150, %c0_151] : memref<2x2x32xf32, #tpu.memory_space<vmem>>, vector<1x2x32xf32>
      %393 = vector.shape_cast %392 : vector<1x2x32xf32> to vector<2x32xf32>
      %394 = vector.shape_cast %350 : vector<2x32xf32> to vector<1x2x32xf32>
      tpu.vector_store %arg7[%c0_149, %c0_150, %c0_151], %394 {strides = array<i32>} : memref<2x2x32xf32, #tpu.memory_space<vmem>>, vector<1x2x32xf32>,
      %c1_152 = arith.constant 1 : index
      %c0_153 = arith.constant 0 : index
      %c0_154 = arith.constant 0 : index
      %395 = vector.load %arg7[%c1_152, %c0_153, %c0_154] : memref<2x2x32xf32, #tpu.memory_space<vmem>>, vector<1x2x32xf32>
      %396 = vector.shape_cast %395 : vector<1x2x32xf32> to vector<2x32xf32>
      %397 = vector.shape_cast %373 : vector<2x32xf32> to vector<1x2x32xf32>
      tpu.vector_store %arg7[%c1_152, %c0_153, %c0_154], %397 {strides = array<i32>} : memref<2x2x32xf32, #tpu.memory_space<vmem>>, vector<1x2x32xf32>,
    } else {
    }
    return
  }
  func.func @transform_0(%arg0: i32) -> (i32, i32, i32) {
    %c0_i32 = arith.constant 0 : i32
    %c0_i32_0 = arith.constant 0 : i32
    %c0_i32_1 = arith.constant 0 : i32
    return %arg0, %c0_i32, %c0_i32_0 : i32, i32, i32
  }
  func.func @transform_1(%arg0: i32) -> (i32, i32, i32) {
    %c1_i32 = arith.constant 1 : i32
    %0 = arith.subi %c1_i32, %arg0 : i32
    %c0_i32 = arith.constant 0 : i32
    %c0_i32_0 = arith.constant 0 : i32
    %c0_i32_1 = arith.constant 0 : i32
    return %0, %c0_i32, %c0_i32_0 : i32, i32, i32
  }
  func.func @transform_2(%arg0: i32) -> (i32, i32, i32) {
    %c0_i32 = arith.constant 0 : i32
    %c0_i32_0 = arith.constant 0 : i32
    %c0_i32_1 = arith.constant 0 : i32
    %c0_i32_2 = arith.constant 0 : i32
    return %c0_i32, %c0_i32_0, %c0_i32_1 : i32, i32, i32
  }
  func.func @transform_3(%arg0: i32) -> (i32, i32, i32) {
    %c0_i32 = arith.constant 0 : i32
    %c0_i32_0 = arith.constant 0 : i32
    %c0_i32_1 = arith.constant 0 : i32
    return %arg0, %c0_i32, %c0_i32_0 : i32, i32, i32
  }
  func.func @transform_4(%arg0: i32) -> (i32, i32, i32) {
    %c1_i32 = arith.constant 1 : i32
    %0 = arith.subi %c1_i32, %arg0 : i32
    %c0_i32 = arith.constant 0 : i32
    %c0_i32_0 = arith.constant 0 : i32
    %c0_i32_1 = arith.constant 0 : i32
    return %0, %c0_i32, %c0_i32_0 : i32, i32, i32
  }
  func.func @transform_5(%arg0: i32) -> (i32, i32, i32) {
    %c0_i32 = arith.constant 0 : i32
    %c0_i32_0 = arith.constant 0 : i32
    %c0_i32_1 = arith.constant 0 : i32
    %c0_i32_2 = arith.constant 0 : i32
    return %c0_i32, %c0_i32_0, %c0_i32_1 : i32, i32, i32
  }
  func.func @transform_6(%arg0: i32) -> (i32, i32, i32) {
    %c0_i32 = arith.constant 0 : i32
    %c0_i32_0 = arith.constant 0 : i32
    %c0_i32_1 = arith.constant 0 : i32
    %c0_i32_2 = arith.constant 0 : i32
    return %c0_i32, %c0_i32_0, %c0_i32_1 : i32, i32, i32
  }
}

</mosaic_0001>

<bundles_post_ra>
// kernel: encoder_forward.1
= control target key start
LH: loop header
LB: loop body
LE: loop exit
PB: predicated region body
PF: predicated region fallthrough
CT: control target
= control target key end

     0   :  { %12 = vsyncpa [#allocation7], 0  ;;  %s3242_s0 = inlined_call_operand.vmem [shape: f32[16,2,128], index: 0, kind: input, shape index: {}]   ;;  %s3243_s1 = inlined_call_operand.vmem [shape: f32[16,2,128], index: 1, kind: input, shape index: {}]   ;;  %s3244_s2 = inlined_call_operand.vmem [shape: f32[2,32,128], index: 2, kind: input, shape index: {}]   ;;  %s3245_s3 = inlined_call_operand.vmem [shape: f32[16,2,32], index: 3, kind: output, shape index: {0}]   ;;  %s3246_s4 = inlined_call_operand.vmem [shape: f32[16,2,32], index: 4, kind: output, shape index: {1}]   ;;  %s3247_s5 = inlined_call_operand.hbm [shape: f32[2,2,32], index: 5, kind: output, shape index: {2}]   ;;  %s3248_s6 = inlined_call_operand.hbm [shape: f32[2,2,32], index: 6, kind: output, shape index: {3}]  }
   0x1   :  { %13 = vsyncpa [#allocation9], 0  ;;  %s2792_s21 = smov 0  }
   0x2 LB: > { %s2798_s22 = sadd.s32 4294967295, %s2746_s21   ;;  %p2190_p0 = scmp.ge.s32.totalorder %s2746_s21, 1  ;;  %s2746_s21 = sphi %s2792_s21, %s19_s21  }
   0x3   : > { %p229_p1 = scmp.lt.s32.totalorder %s2746_s21, 3 }
   0x5   : > { %p230_p2 = pnand %p2190_p0, %p229_p1 }
   0x6   : > { %s2191_s23 = sshll.u32 (!%p230_p2), %s2798_s22, 3  ;;  %s277_s24 = ssub.s32 (!%p230_p2), 1, %s2798_s22 }
   0x7   : > { %233 = sbr.rel (%p230_p2) target bundleno = 5586 (0x15d2), region = 32  ;;  %p272_p3 = scmp.lt.s32.totalorder (!%p230_p2), %s2191_s23, 15 }
   0x8   : > { %s2193_s25 = sshll.u32 (!%p230_p2), %s277_s24, 3  ;;  %p2199_p5 = scmp.ne.s32.totalorder (!%p230_p2), %s2798_s22, 0 }
   0x9   : > { %p279_p4 = scmp.lt.s32.totalorder (!%p230_p2), %s2193_s25, 15 }
   0xc   : > { %s3250_s23 = smov (!%p272_p3, %s2191_s23), 15  ;;  %s3252_s25 = smov (!%p279_p4, %s2193_s25), 15 }
   0xd   : > { %s2192_s26 = sshll.u32 %s3250_s23, 1  ;;  %s2194_s30 = sshll.u32 %s3252_s25, 1 }
   0xe   : > { %s2807_s29 = scalar_lea.vmem %s3242_s0, %s2192_s26  ;;  %s2812_s9 = scalar_lea.vmem %s3243_s1, %s2194_s30 }
   0xf   : > { %s2817_s12 = scalar_lea.vmem %s3245_s3, %s2192_s26  ;;  %s2822_s15 = scalar_lea.vmem %s3246_s4, %s2194_s30 }
  0x10   : > { %302 = sbr.rel (%p2199_p5) target bundleno = 24 (0x18), region = 36 }
  0x15   : > { %vm303_vm0 = vcmask 254976   ;;  %v2748_v0 = vmov 0.0  }
  0x16   : > { %304 = vst.msk [vmem:[#allocation2] sm:$0x3] %vm303_vm0, %v2748_v0  ;;  %305 = vst.msk [vmem:[#allocation3] sm:$0x3] %vm303_vm0, %v2748_v0 }
  0x17   : > { %306 = vst.msk [vmem:[#allocation4] sm:$0x3] %vm303_vm0, %v2748_v0  ;;  %307 = vst.msk [vmem:[#allocation5] sm:$0x3] %vm303_vm0, %v2748_v0 }
  0x18 PF: > { %v2828_v1 = vld [vmem:[%s3244_s2 + $0x18] sm:$0xff]  ;;  %v2749_v3 = vmov 0.0   ;;  %v2840_v4 = vld [vmem:[%s3244_s2 + $0x10] sm:$0xff]  ;;  %v2854_v6 = vld [vmem:[%s3244_s2 + $0x8] sm:$0xff]  ;;  %vm2750_vm1 = vmmov 0   ;;  %vm322_vm2 = vcmask 261120  }
  0x19   : > { %v2833_v2 = vld [vmem:[%s3244_s2 + $0x38] sm:$0xff]  ;;  %2351 = vmatprep.subr.mxu0 %v2749_v3  ;;  %2362 = vmatprep.subr.mxu1 %v2749_v3  ;;  %v2845_v5 = vld [vmem:[%s3244_s2 + $0x30] sm:$0xff]  ;;  %v2861_v7 = vld [vmem:[%s3244_s2 + $0x28] sm:$0xff]  ;;  %s2751_s13 = smov 32   ;;  %s2752_s14 = smov 64   ;;  %vm429_vm3 = vcmask 254976  }
  0x1a   : > { %2352 = vmatpush3.msra.mxu0 %v2828_v1  ;;  %2363 = vmatpush3.msra.mxu1 %v2833_v2  ;;  %v2868_v8 = vld [vmem:[%s3244_s2] sm:$0xff]  ;;  %v2206_v16 = vld [vmem:[%s2812_s9 + $0xe] sm:$0x3]  ;;  %v2214_v56 = vld [vmem:[%s2812_s9 + $0xc] sm:$0x3]  ;;  %p2264_p6 = scmp.ne.s32.totalorder %s2798_s22, 1 }
  0x1b   : > { %2353 = vmatprep.subr.mxu0 %v2749_v3  ;;  %2364 = vmatprep.subr.mxu1 %v2749_v3  ;;  %v2876_v10 = vld [vmem:[%s3244_s2 + $0x20] sm:$0xff] }
  0x1c   : > { %2354 = vmatpush3.msra.mxu0 %v2840_v4  ;;  %2365 = vmatpush3.msra.mxu1 %v2845_v5  ;;  %v321_v14 = vld [vmem:[%s2807_s29] sm:$0x3]  ;;  %v2210_v52 = vld [vmem:[%s2807_s29 + $0x2] sm:$0x3] }
  0x1d   : > { %2355 = vmatprep.subr.mxu0 %v2749_v3  ;;  %2366 = vmatprep.subr.mxu1 %v2749_v3  ;;  %v317_v9 = vld [vmem:[#allocation2] sm:$0x3]  ;;  %v318_v11 = vld [vmem:[#allocation3] sm:$0x3] }
  0x1e   : > { %2356 = vmatpush3.msra.mxu0 %v2854_v6  ;;  %2359 = vmatprep.mubr.msk.f32.mxu0 %vm2750_vm1, %v2749_v3  ;;  %v319_v12 = vld [vmem:[#allocation4] sm:$0x3]  ;;  %v320_v13 = vld [vmem:[#allocation5] sm:$0x3] }
  0x1f   : > { %2357 = vmatprep.subr.mxu0 %v2749_v3  ;;  %2367 = vmatpush3.msra.mxu1 %v2861_v7 }
  0x20   : > { %2358 = vmatpush3.msra.mxu0 %v2868_v8  ;;  %2368 = vmatprep.subr.mxu1 %v2749_v3 }
  0x21   : > { %2360 = vmatmul.mubr.msk.f32.vlgmr.msra.gmra.mxu0 %vm322_vm2, %v317_v9  ;;  %2369 = vmatpush3.msra.mxu1 %v2876_v10 }
  0x22   : > { %2370 = vmatprep.mubr.msk.f32.mxu1 %vm2750_vm1, %v2749_v3  ;;  %405 = vrot.lane.b32.xlu1 %v318_v11, %s2751_s13 }
  0x23   : > { %2371 = vmatmul.mubr.msk.f32.vlgmr.msra.gmra.mxu1 %vm322_vm2, %v319_v12  ;;  %2373 = vmatprep.subr.mxu0 %v2749_v3 }
  0x24   : > { %2374 = vmatpush3.msra.mxu0 %v2828_v1  ;;  %2384 = vmatprep.subr.mxu1 %v2749_v3 }
  0x25   : > { %2375 = vmatprep.subr.mxu0 %v2749_v3  ;;  %2385 = vmatpush3.msra.mxu1 %v2833_v2 }
  0x26   : > { %515 = vrot.lane.b32.xlu1 %v320_v13, %s2751_s13  ;;  %2376 = vmatpush3.msra.mxu0 %v2840_v4 }
  0x27   : > { %2377 = vmatprep.subr.mxu0 %v2749_v3  ;;  %2386 = vmatprep.subr.mxu1 %v2749_v3 }
  0x28   : > { %2378 = vmatpush3.msra.mxu0 %v2854_v6  ;;  %2381 = vmatprep.mubr.msk.f32.mxu0 %vm2750_vm1, %v2749_v3 }
  0x29   : > { %2379 = vmatprep.subr.mxu0 %v2749_v3  ;;  %2387 = vmatpush3.msra.mxu1 %v2845_v5 }
  0x2a   : > { %2380 = vmatpush3.msra.mxu0 %v2868_v8  ;;  %2388 = vmatprep.subr.mxu1 %v2749_v3 }
  0x2b   : > { %2389 = vmatpush3.msra.mxu1 %v2861_v7  ;;  %2392 = vmatprep.mubr.msk.f32.mxu1 %vm2750_vm1, %v2749_v3 }
  0x2c   : > { %2390 = vmatprep.subr.mxu1 %v2749_v3  ;;  %2395 = vmatprep.subr.mxu0 %v2749_v3 }
  0x2d   : > { %2391 = vmatpush3.msra.mxu1 %v2876_v10 }
  0x2e   : > { %2406 = vmatprep.subr.mxu1 %v2749_v3 }
  0x94   : > { %v406_v36 = vpop.permute.xlu1 %405 }
  0x98   : > { %v516_v38 = vpop.permute.xlu1 %515 }
  0xe1   : > { %v392_v15 = vpop.f32.mrf.mxu0 }
  0xe2   : > { %v396_v17 = vadd.f32 %v392_v15, %v321_v14 }
  0xe3   : > { %v2361_v18 = vpop.f32.mrf.mxu0  ;;  %v502_v19 = vpop.f32.mrf.mxu1 }
  0xe4   : > { %2556 = vtanh.f32 %v396_v17  ;;  %v506_v20 = vadd.f32 %v2206_v16, %v502_v19  ;;  %v2205_v24 = vmul.f32 -1.442695, %v396_v17 }
  0xe5   : > { %v2372_v21 = vpop.f32.mrf.mxu1 }
  0xe6   : > { %2558 = vtanh.f32 %v506_v20  ;;  %v2208_v25 = vmul.f32 -1.442695, %v506_v20 }
  0xe7   : > { %2560 = vpow2.f32 %v2205_v24 }
  0xe8   : > { %2562 = vpow2.f32 %v2208_v25 }
  0xf1   : > { %v2557_v22 = vpop.eup %2556 }
  0xf2   : > { %410 = vrot.lane.b32.xlu0 %v2557_v22, %s2751_s13 }
  0xf3   : > { %v2559_v23 = vpop.eup %2558 }
  0xf4   : > { %v2561_v26 = vpop.eup %2560 }
  0xf5   : > { %v400_v27 = vadd.f32 1.0, %v2561_v26  ;;  %v2563_v28 = vpop.eup %2562 }
  0xf6   : > { %520 = vrot.lane.b32.xlu0 %v2559_v23, %s2751_s13  ;;  %v510_v29 = vadd.f32 1.0, %v2563_v28 }
  0xf7   : > { %2564 = vrcp.f32 %v400_v27 }
  0xf8   : > { %2566 = vrcp.f32 %v510_v29 }
 0x104   : > { %v2565_v30 = vpop.eup %2564 }
 0x105   : > { %v2567_v33 = vpop.eup %2566  ;;  %v408_v37 = vmul.f32 %v2565_v30, %v406_v36 }
 0x106   : > { %v518_v41 = vmul.f32 %v2567_v33, %v516_v38 }
 0x164   : > { %v411_v31 = vpop.permute.xlu0 %410 }
 0x165   : > { %v413_v32 = vmul.f32 %v2565_v30, %v411_v31 }
 0x167   : > { %415 = vrot.lane.b32.xlu0 %v413_v32, %s2751_s13 }
 0x168   : > { %v521_v34 = vpop.permute.xlu0 %520 }
 0x169   : > { %v523_v35 = vmul.f32 %v2567_v33, %v521_v34 }
 0x16b   : > { %525 = vrot.lane.b32.xlu1 %v523_v35, %s2751_s13 }
 0x1d9   : > { %v416_v39 = vpop.permute.xlu0 %415 }
 0x1da   : > { %v2917_v40 = vadd.f32 %v416_v39, %v408_v37  ;;  %v2222_v37 = vld [vmem:[%s2812_s9 + $0xa] sm:$0x3] }
 0x1dc   : > { %2568 = vtanh.f32 %v2917_v40 }
 0x1dd   : > { %v526_v42 = vpop.permute.xlu1 %525 }
 0x1de   : > { %v2920_v43 = vadd.f32 %v526_v42, %v518_v41 }
 0x1e0   : > { %2570 = vtanh.f32 %v2920_v43 }
 0x1e9   : > { %v2569_v44 = vpop.eup %2568 }
 0x1ea   : > { %421 = vrot.lane.b32.xlu0 %v2569_v44, %s2751_s13 }
 0x1ed   : > { %v2571_v45 = vpop.eup %2570 }
 0x1ee   : > { %531 = vrot.lane.b32.xlu1 %v2571_v45, %s2751_s13 }
 0x25c   : > { %v422_v46 = vpop.permute.xlu0 %421 }
 0x25d   : > { %v424_v47 = vmul.f32 %v2565_v30, %v422_v46 }
 0x25f   : > { %426 = vrot.lane.b32.xlu0 %v424_v47, %s2752_s14 }
 0x260   : > { %v532_v48 = vpop.permute.xlu1 %531 }
 0x261   : > { %v534_v49 = vmul.f32 %v2567_v33, %v532_v48  ;;  %v2218_v33 = vld [vmem:[%s2807_s29 + $0x4] sm:$0x3] }
 0x263   : > { %536 = vrot.lane.b32.xlu1 %v534_v49, %s2752_s14 }
 0x2d1   : > { %v427_v50 = vpop.permute.xlu0 %426 }
 0x2d2   : > { %430 = vst.msk [vmem:[%s2817_s12] sm:$0x3] %vm429_vm3, %v427_v50  ;;  %2382 = vmatmul.mubr.msk.f32.vlgmr.msra.gmra.mxu0 %vm322_vm2, %v427_v50 }
 0x2d3   : > { %2396 = vmatpush3.msra.mxu0 %v2828_v1  ;;  %2403 = vmatprep.mubr.msk.f32.mxu0 %vm2750_vm1, %v2749_v3 }
 0x2d4   : > { %2397 = vmatprep.subr.mxu0 %v2749_v3 }
 0x2d5   : > { %v537_v51 = vpop.permute.xlu1 %536  ;;  %2398 = vmatpush3.msra.mxu0 %v2840_v4 }
 0x2d6   : > { %2209 = vst.msk [vmem:[%s2822_s15 + $0xe] sm:$0x3] %vm429_vm3, %v537_v51  ;;  %2393 = vmatmul.mubr.msk.f32.vlgmr.msra.gmra.mxu1 %vm322_vm2, %v537_v51  ;;  %2399 = vmatprep.subr.mxu0 %v2749_v3 }
 0x2d7   : > { %2400 = vmatpush3.msra.mxu0 %v2854_v6  ;;  %2407 = vmatpush3.msra.mxu1 %v2833_v2 }
 0x2d8   : > { %2401 = vmatprep.subr.mxu0 %v2749_v3  ;;  %2408 = vmatprep.subr.mxu1 %v2749_v3 }
 0x2d9   : > { %2402 = vmatpush3.msra.mxu0 %v2868_v8  ;;  %2409 = vmatpush3.msra.mxu1 %v2845_v5 }
 0x2da   : > { %2410 = vmatprep.subr.mxu1 %v2749_v3  ;;  %2414 = vmatprep.mubr.msk.f32.mxu1 %vm2750_vm1, %v2749_v3 }
 0x2db   : > { %2411 = vmatpush3.msra.mxu1 %v2861_v7  ;;  %2417 = vmatprep.subr.mxu0 %v2749_v3 }
 0x2dc   : > { %2412 = vmatprep.subr.mxu1 %v2749_v3 }
 0x2dd   : > { %2413 = vmatpush3.msra.mxu1 %v2876_v10 }
 0x2de   : > { %2428 = vmatprep.subr.mxu1 %v2749_v3 }
 0x392   : > { %v611_v53 = vpop.f32.mrf.mxu0 }
 0x393   : > { %v615_v54 = vadd.f32 %v2210_v52, %v611_v53 }
 0x394   : > { %v2383_v55 = vpop.f32.mrf.mxu0 }
 0x395   : > { %2572 = vtanh.f32 %v615_v54  ;;  %v2212_v62 = vmul.f32 -1.442695, %v615_v54 }
 0x396   : > { %v716_v57 = vpop.f32.mrf.mxu1 }
 0x397   : > { %v720_v58 = vadd.f32 %v2214_v56, %v716_v57 }
 0x398   : > { %v2394_v59 = vpop.f32.mrf.mxu1 }
 0x399   : > { %2574 = vtanh.f32 %v720_v58  ;;  %v2216_v63 = vmul.f32 -1.442695, %v720_v58 }
 0x39a   : > { %2576 = vpow2.f32 %v2212_v62 }
 0x39b   : > { %2578 = vpow2.f32 %v2216_v63 }
 0x3a2   : > { %v2573_v60 = vpop.eup %2572 }
 0x3a3   : > { %625 = vrot.lane.b32.xlu0 %v2573_v60, %s2751_s13 }
 0x3a6   : > { %v2575_v61 = vpop.eup %2574 }
 0x3a7   : > { %730 = vrot.lane.b32.xlu1 %v2575_v61, %s2751_s13  ;;  %v2577_v0 = vpop.eup %2576 }
 0x3a8   : > { %v619_v9 = vadd.f32 1.0, %v2577_v0  ;;  %v2579_v11 = vpop.eup %2578 }
 0x3a9   : > { %v724_v12 = vadd.f32 1.0, %v2579_v11 }
 0x3aa   : > { %2580 = vrcp.f32 %v619_v9 }
 0x3ab   : > { %2582 = vrcp.f32 %v724_v12 }
 0x3b7   : > { %v2581_v13 = vpop.eup %2580 }
 0x3b8   : > { %v2583_v16 = vpop.eup %2582  ;;  %v623_v19 = vmul.f32 %v2581_v13, %v2917_v40 }
 0x3b9   : > { %v728_v22 = vmul.f32 %v2583_v16, %v2920_v43 }
 0x415   : > { %v626_v14 = vpop.permute.xlu0 %625 }
 0x416   : > { %v628_v15 = vmul.f32 %v2581_v13, %v626_v14  ;;  %v2226_v14 = vld [vmem:[%s2807_s29 + $0x6] sm:$0x3] }
 0x418   : > { %630 = vrot.lane.b32.xlu0 %v628_v15, %s2751_s13 }
 0x419   : > { %v731_v17 = vpop.permute.xlu1 %730 }
 0x41a   : > { %v733_v18 = vmul.f32 %v2583_v16, %v731_v17 }
 0x41c   : > { %735 = vrot.lane.b32.xlu1 %v733_v18, %s2751_s13  ;;  %v2230_v18 = vld [vmem:[%s2812_s9 + $0x8] sm:$0x3] }
 0x48a   : > { %v631_v20 = vpop.permute.xlu0 %630 }
 0x48b   : > { %v2960_v21 = vadd.f32 %v631_v20, %v623_v19 }
 0x48d   : > { %2584 = vtanh.f32 %v2960_v21 }
 0x48e   : > { %v736_v23 = vpop.permute.xlu1 %735 }
 0x48f   : > { %v2964_v24 = vadd.f32 %v736_v23, %v728_v22 }
 0x491   : > { %2586 = vtanh.f32 %v2964_v24 }
 0x49a   : > { %v2585_v25 = vpop.eup %2584 }
 0x49b   : > { %636 = vrot.lane.b32.xlu0 %v2585_v25, %s2751_s13 }
 0x49e   : > { %v2587_v26 = vpop.eup %2586 }
 0x49f   : > { %741 = vrot.lane.b32.xlu1 %v2587_v26, %s2751_s13 }
 0x50d   : > { %v637_v27 = vpop.permute.xlu0 %636 }
 0x50e   : > { %v639_v28 = vmul.f32 %v2581_v13, %v637_v27 }
 0x510   : > { %641 = vrot.lane.b32.xlu0 %v639_v28, %s2752_s14 }
 0x511   : > { %v742_v29 = vpop.permute.xlu1 %741 }
 0x512   : > { %v744_v30 = vmul.f32 %v2583_v16, %v742_v29 }
 0x514   : > { %746 = vrot.lane.b32.xlu1 %v744_v30, %s2752_s14 }
 0x582   : > { %v642_v31 = vpop.permute.xlu0 %641 }
 0x583   : > { %2213 = vst.msk [vmem:[%s2817_s12 + $0x2] sm:$0x3] %vm429_vm3, %v642_v31  ;;  %2404 = vmatmul.mubr.msk.f32.vlgmr.msra.gmra.mxu0 %vm322_vm2, %v642_v31 }
 0x584   : > { %2418 = vmatpush3.msra.mxu0 %v2828_v1  ;;  %2425 = vmatprep.mubr.msk.f32.mxu0 %vm2750_vm1, %v2749_v3 }
 0x585   : > { %2419 = vmatprep.subr.mxu0 %v2749_v3 }
 0x586   : > { %v747_v32 = vpop.permute.xlu1 %746  ;;  %2420 = vmatpush3.msra.mxu0 %v2840_v4 }
 0x587   : > { %2217 = vst.msk [vmem:[%s2822_s15 + $0xc] sm:$0x3] %vm429_vm3, %v747_v32  ;;  %2415 = vmatmul.mubr.msk.f32.vlgmr.msra.gmra.mxu1 %vm322_vm2, %v747_v32  ;;  %2421 = vmatprep.subr.mxu0 %v2749_v3 }
 0x588   : > { %2422 = vmatpush3.msra.mxu0 %v2854_v6  ;;  %2429 = vmatpush3.msra.mxu1 %v2833_v2 }
 0x589   : > { %2423 = vmatprep.subr.mxu0 %v2749_v3  ;;  %2430 = vmatprep.subr.mxu1 %v2749_v3 }
 0x58a   : > { %2424 = vmatpush3.msra.mxu0 %v2868_v8  ;;  %2431 = vmatpush3.msra.mxu1 %v2845_v5 }
 0x58b   : > { %2432 = vmatprep.subr.mxu1 %v2749_v3  ;;  %2436 = vmatprep.mubr.msk.f32.mxu1 %vm2750_vm1, %v2749_v3 }
 0x58c   : > { %2433 = vmatpush3.msra.mxu1 %v2861_v7  ;;  %2439 = vmatprep.subr.mxu0 %v2749_v3 }
 0x58d   : > { %2434 = vmatprep.subr.mxu1 %v2749_v3 }
 0x58e   : > { %2435 = vmatpush3.msra.mxu1 %v2876_v10 }
 0x58f   : > { %2450 = vmatprep.subr.mxu1 %v2749_v3 }
 0x643   : > { %v821_v34 = vpop.f32.mrf.mxu0 }
 0x644   : > { %v825_v35 = vadd.f32 %v2218_v33, %v821_v34 }
 0x645   : > { %v2405_v36 = vpop.f32.mrf.mxu0 }
 0x646   : > { %2588 = vtanh.f32 %v825_v35  ;;  %v2220_v43 = vmul.f32 -1.442695, %v825_v35 }
 0x647   : > { %v926_v38 = vpop.f32.mrf.mxu1 }
 0x648   : > { %v930_v39 = vadd.f32 %v2222_v37, %v926_v38 }
 0x649   : > { %v2416_v40 = vpop.f32.mrf.mxu1 }
 0x64a   : > { %2590 = vtanh.f32 %v930_v39  ;;  %v2224_v44 = vmul.f32 -1.442695, %v930_v39 }
 0x64b   : > { %2592 = vpow2.f32 %v2220_v43 }
 0x64c   : > { %2594 = vpow2.f32 %v2224_v44 }
 0x653   : > { %v2589_v41 = vpop.eup %2588 }
 0x654   : > { %835 = vrot.lane.b32.xlu0 %v2589_v41, %s2751_s13 }
 0x657   : > { %v2591_v42 = vpop.eup %2590 }
 0x658   : > { %940 = vrot.lane.b32.xlu1 %v2591_v42, %s2751_s13  ;;  %v2593_v45 = vpop.eup %2592 }
 0x659   : > { %v829_v46 = vadd.f32 1.0, %v2593_v45  ;;  %v2595_v47 = vpop.eup %2594 }
 0x65a   : > { %v934_v48 = vadd.f32 1.0, %v2595_v47 }
 0x65b   : > { %2596 = vrcp.f32 %v829_v46 }
 0x65c   : > { %2598 = vrcp.f32 %v934_v48 }
 0x668   : > { %v2597_v49 = vpop.eup %2596 }
 0x669   : > { %v2599_v52 = vpop.eup %2598  ;;  %v833_v55 = vmul.f32 %v2597_v49, %v2960_v21 }
 0x66a   : > { %v938_v58 = vmul.f32 %v2599_v52, %v2964_v24 }
 0x6c6   : > { %v836_v50 = vpop.permute.xlu0 %835 }
 0x6c7   : > { %v838_v51 = vmul.f32 %v2597_v49, %v836_v50  ;;  %v2234_v50 = vld [vmem:[%s2807_s29 + $0x8] sm:$0x3] }
 0x6c9   : > { %840 = vrot.lane.b32.xlu0 %v838_v51, %s2751_s13 }
 0x6ca   : > { %v941_v53 = vpop.permute.xlu1 %940 }
 0x6cb   : > { %v943_v54 = vmul.f32 %v2599_v52, %v941_v53 }
 0x6cd   : > { %945 = vrot.lane.b32.xlu1 %v943_v54, %s2751_s13  ;;  %v2238_v54 = vld [vmem:[%s2812_s9 + $0x6] sm:$0x3] }
 0x73b   : > { %v841_v56 = vpop.permute.xlu0 %840 }
 0x73c   : > { %v3004_v57 = vadd.f32 %v841_v56, %v833_v55 }
 0x73e   : > { %2600 = vtanh.f32 %v3004_v57 }
 0x73f   : > { %v946_v59 = vpop.permute.xlu1 %945 }
 0x740   : > { %v3008_v60 = vadd.f32 %v946_v59, %v938_v58 }
 0x742   : > { %2602 = vtanh.f32 %v3008_v60 }
 0x74b   : > { %v2601_v61 = vpop.eup %2600 }
 0x74c   : > { %846 = vrot.lane.b32.xlu0 %v2601_v61, %s2751_s13 }
 0x74f   : > { %v2603_v62 = vpop.eup %2602 }
 0x750   : > { %951 = vrot.lane.b32.xlu1 %v2603_v62, %s2751_s13 }
 0x7be   : > { %v847_v63 = vpop.permute.xlu0 %846 }
 0x7bf   : > { %v849_v0 = vmul.f32 %v2597_v49, %v847_v63 }
 0x7c1   : > { %851 = vrot.lane.b32.xlu0 %v849_v0, %s2752_s14 }
 0x7c2   : > { %v952_v9 = vpop.permute.xlu1 %951 }
 0x7c3   : > { %v954_v11 = vmul.f32 %v2599_v52, %v952_v9 }
 0x7c5   : > { %956 = vrot.lane.b32.xlu1 %v954_v11, %s2752_s14 }
 0x833   : > { %v852_v12 = vpop.permute.xlu0 %851 }
 0x834   : > { %2221 = vst.msk [vmem:[%s2817_s12 + $0x4] sm:$0x3] %vm429_vm3, %v852_v12  ;;  %2426 = vmatmul.mubr.msk.f32.vlgmr.msra.gmra.mxu0 %vm322_vm2, %v852_v12 }
 0x835   : > { %2440 = vmatpush3.msra.mxu0 %v2828_v1  ;;  %2447 = vmatprep.mubr.msk.f32.mxu0 %vm2750_vm1, %v2749_v3 }
 0x836   : > { %2441 = vmatprep.subr.mxu0 %v2749_v3 }
 0x837   : > { %v957_v13 = vpop.permute.xlu1 %956  ;;  %2442 = vmatpush3.msra.mxu0 %v2840_v4 }
 0x838   : > { %2225 = vst.msk [vmem:[%s2822_s15 + $0xa] sm:$0x3] %vm429_vm3, %v957_v13  ;;  %2437 = vmatmul.mubr.msk.f32.vlgmr.msra.gmra.mxu1 %vm322_vm2, %v957_v13  ;;  %2443 = vmatprep.subr.mxu0 %v2749_v3 }
 0x839   : > { %2444 = vmatpush3.msra.mxu0 %v2854_v6  ;;  %2451 = vmatpush3.msra.mxu1 %v2833_v2 }
 0x83a   : > { %2445 = vmatprep.subr.mxu0 %v2749_v3  ;;  %2452 = vmatprep.subr.mxu1 %v2749_v3 }
 0x83b   : > { %2446 = vmatpush3.msra.mxu0 %v2868_v8  ;;  %2453 = vmatpush3.msra.mxu1 %v2845_v5 }
 0x83c   : > { %2454 = vmatprep.subr.mxu1 %v2749_v3  ;;  %2458 = vmatprep.mubr.msk.f32.mxu1 %vm2750_vm1, %v2749_v3 }
 0x83d   : > { %2455 = vmatpush3.msra.mxu1 %v2861_v7  ;;  %2461 = vmatprep.subr.mxu0 %v2749_v3 }
 0x83e   : > { %2456 = vmatprep.subr.mxu1 %v2749_v3 }
 0x83f   : > { %2457 = vmatpush3.msra.mxu1 %v2876_v10 }
 0x840   : > { %2472 = vmatprep.subr.mxu1 %v2749_v3 }
 0x8f4   : > { %v1031_v15 = vpop.f32.mrf.mxu0 }
 0x8f5   : > { %v1035_v16 = vadd.f32 %v2226_v14, %v1031_v15 }
 0x8f6   : > { %v2427_v17 = vpop.f32.mrf.mxu0 }
 0x8f7   : > { %2604 = vtanh.f32 %v1035_v16  ;;  %v2228_v24 = vmul.f32 -1.442695, %v1035_v16 }
 0x8f8   : > { %v1136_v19 = vpop.f32.mrf.mxu1 }
 0x8f9   : > { %v1140_v20 = vadd.f32 %v2230_v18, %v1136_v19 }
 0x8fa   : > { %v2438_v21 = vpop.f32.mrf.mxu1 }
 0x8fb   : > { %2606 = vtanh.f32 %v1140_v20  ;;  %v2232_v25 = vmul.f32 -1.442695, %v1140_v20 }
 0x8fc   : > { %2608 = vpow2.f32 %v2228_v24 }
 0x8fd   : > { %2610 = vpow2.f32 %v2232_v25 }
 0x904   : > { %v2605_v22 = vpop.eup %2604 }
 0x905   : > { %1045 = vrot.lane.b32.xlu0 %v2605_v22, %s2751_s13 }
 0x908   : > { %v2607_v23 = vpop.eup %2606 }
 0x909   : > { %1150 = vrot.lane.b32.xlu1 %v2607_v23, %s2751_s13  ;;  %v2609_v26 = vpop.eup %2608 }
 0x90a   : > { %v1039_v27 = vadd.f32 1.0, %v2609_v26  ;;  %v2611_v28 = vpop.eup %2610 }
 0x90b   : > { %v1144_v29 = vadd.f32 1.0, %v2611_v28 }
 0x90c   : > { %2612 = vrcp.f32 %v1039_v27 }
 0x90d   : > { %2614 = vrcp.f32 %v1144_v29 }
 0x919   : > { %v2613_v30 = vpop.eup %2612 }
 0x91a   : > { %v2615_v33 = vpop.eup %2614  ;;  %v1043_v36 = vmul.f32 %v2613_v30, %v3004_v57 }
 0x91b   : > { %v1148_v39 = vmul.f32 %v2615_v33, %v3008_v60 }
 0x977   : > { %v1046_v31 = vpop.permute.xlu0 %1045 }
 0x978   : > { %v1048_v32 = vmul.f32 %v2613_v30, %v1046_v31  ;;  %v2242_v31 = vld [vmem:[%s2807_s29 + $0xa] sm:$0x3] }
 0x97a   : > { %1050 = vrot.lane.b32.xlu0 %v1048_v32, %s2751_s13 }
 0x97b   : > { %v1151_v34 = vpop.permute.xlu1 %1150 }
 0x97c   : > { %v1153_v35 = vmul.f32 %v2615_v33, %v1151_v34 }
 0x97e   : > { %1155 = vrot.lane.b32.xlu1 %v1153_v35, %s2751_s13  ;;  %v2246_v35 = vld [vmem:[%s2812_s9 + $0x4] sm:$0x3] }
 0x9ec   : > { %v1051_v37 = vpop.permute.xlu0 %1050 }
 0x9ed   : > { %v3048_v38 = vadd.f32 %v1051_v37, %v1043_v36 }
 0x9ef   : > { %2616 = vtanh.f32 %v3048_v38 }
 0x9f0   : > { %v1156_v40 = vpop.permute.xlu1 %1155 }
 0x9f1   : > { %v3052_v41 = vadd.f32 %v1156_v40, %v1148_v39 }
 0x9f3   : > { %2618 = vtanh.f32 %v3052_v41 }
 0x9fc   : > { %v2617_v42 = vpop.eup %2616 }
 0x9fd   : > { %1056 = vrot.lane.b32.xlu0 %v2617_v42, %s2751_s13 }
 0xa00   : > { %v2619_v43 = vpop.eup %2618 }
 0xa01   : > { %1161 = vrot.lane.b32.xlu1 %v2619_v43, %s2751_s13 }
 0xa6f   : > { %v1057_v44 = vpop.permute.xlu0 %1056 }
 0xa70   : > { %v1059_v45 = vmul.f32 %v2613_v30, %v1057_v44 }
 0xa72   : > { %1061 = vrot.lane.b32.xlu0 %v1059_v45, %s2752_s14 }
 0xa73   : > { %v1162_v46 = vpop.permute.xlu1 %1161 }
 0xa74   : > { %v1164_v47 = vmul.f32 %v2615_v33, %v1162_v46 }
 0xa76   : > { %1166 = vrot.lane.b32.xlu1 %v1164_v47, %s2752_s14 }
 0xae4   : > { %v1062_v48 = vpop.permute.xlu0 %1061 }
 0xae5   : > { %2229 = vst.msk [vmem:[%s2817_s12 + $0x6] sm:$0x3] %vm429_vm3, %v1062_v48  ;;  %2448 = vmatmul.mubr.msk.f32.vlgmr.msra.gmra.mxu0 %vm322_vm2, %v1062_v48 }
 0xae6   : > { %2462 = vmatpush3.msra.mxu0 %v2828_v1  ;;  %2469 = vmatprep.mubr.msk.f32.mxu0 %vm2750_vm1, %v2749_v3 }
 0xae7   : > { %2463 = vmatprep.subr.mxu0 %v2749_v3 }
 0xae8   : > { %v1167_v49 = vpop.permute.xlu1 %1166  ;;  %2464 = vmatpush3.msra.mxu0 %v2840_v4 }
 0xae9   : > { %2233 = vst.msk [vmem:[%s2822_s15 + $0x8] sm:$0x3] %vm429_vm3, %v1167_v49  ;;  %2459 = vmatmul.mubr.msk.f32.vlgmr.msra.gmra.mxu1 %vm322_vm2, %v1167_v49  ;;  %2465 = vmatprep.subr.mxu0 %v2749_v3 }
 0xaea   : > { %2466 = vmatpush3.msra.mxu0 %v2854_v6  ;;  %2473 = vmatpush3.msra.mxu1 %v2833_v2 }
 0xaeb   : > { %2467 = vmatprep.subr.mxu0 %v2749_v3  ;;  %2474 = vmatprep.subr.mxu1 %v2749_v3 }
 0xaec   : > { %2468 = vmatpush3.msra.mxu0 %v2868_v8  ;;  %2475 = vmatpush3.msra.mxu1 %v2845_v5 }
 0xaed   : > { %2476 = vmatprep.subr.mxu1 %v2749_v3  ;;  %2480 = vmatprep.mubr.msk.f32.mxu1 %vm2750_vm1, %v2749_v3 }
 0xaee   : > { %2477 = vmatpush3.msra.mxu1 %v2861_v7  ;;  %2483 = vmatprep.subr.mxu0 %v2749_v3 }
 0xaef   : > { %2478 = vmatprep.subr.mxu1 %v2749_v3 }
 0xaf0   : > { %2479 = vmatpush3.msra.mxu1 %v2876_v10 }
 0xaf1   : > { %2494 = vmatprep.subr.mxu1 %v2749_v3 }
 0xba5   : > { %v1241_v51 = vpop.f32.mrf.mxu0 }
 0xba6   : > { %v1245_v52 = vadd.f32 %v2234_v50, %v1241_v51 }
 0xba7   : > { %v2449_v53 = vpop.f32.mrf.mxu0 }
 0xba8   : > { %2620 = vtanh.f32 %v1245_v52  ;;  %v2236_v60 = vmul.f32 -1.442695, %v1245_v52 }
 0xba9   : > { %v1346_v55 = vpop.f32.mrf.mxu1 }
 0xbaa   : > { %v1350_v56 = vadd.f32 %v2238_v54, %v1346_v55 }
 0xbab   : > { %v2460_v57 = vpop.f32.mrf.mxu1 }
 0xbac   : > { %2622 = vtanh.f32 %v1350_v56  ;;  %v2240_v61 = vmul.f32 -1.442695, %v1350_v56 }
 0xbad   : > { %2624 = vpow2.f32 %v2236_v60 }
 0xbae   : > { %2626 = vpow2.f32 %v2240_v61 }
 0xbb5   : > { %v2621_v58 = vpop.eup %2620 }
 0xbb6   : > { %1255 = vrot.lane.b32.xlu0 %v2621_v58, %s2751_s13 }
 0xbb9   : > { %v2623_v59 = vpop.eup %2622 }
 0xbba   : > { %1360 = vrot.lane.b32.xlu1 %v2623_v59, %s2751_s13  ;;  %v2625_v62 = vpop.eup %2624 }
 0xbbb   : > { %v1249_v63 = vadd.f32 1.0, %v2625_v62  ;;  %v2627_v0 = vpop.eup %2626 }
 0xbbc   : > { %v1354_v9 = vadd.f32 1.0, %v2627_v0 }
 0xbbd   : > { %2628 = vrcp.f32 %v1249_v63 }
 0xbbe   : > { %2630 = vrcp.f32 %v1354_v9 }
 0xbca   : > { %v2629_v11 = vpop.eup %2628 }
 0xbcb   : > { %v2631_v14 = vpop.eup %2630  ;;  %v1253_v17 = vmul.f32 %v2629_v11, %v3048_v38 }
 0xbcc   : > { %v1358_v20 = vmul.f32 %v2631_v14, %v3052_v41 }
 0xc28   : > { %v1256_v12 = vpop.permute.xlu0 %1255 }
 0xc29   : > { %v1258_v13 = vmul.f32 %v2629_v11, %v1256_v12  ;;  %v2254_v12 = vld [vmem:[%s2812_s9 + $0x2] sm:$0x3] }
 0xc2b   : > { %1260 = vrot.lane.b32.xlu0 %v1258_v13, %s2751_s13 }
 0xc2c   : > { %v1361_v15 = vpop.permute.xlu1 %1360 }
 0xc2d   : > { %v1363_v16 = vmul.f32 %v2631_v14, %v1361_v15 }
 0xc2f   : > { %1365 = vrot.lane.b32.xlu1 %v1363_v16, %s2751_s13 }
 0xc9d   : > { %v1261_v18 = vpop.permute.xlu0 %1260 }
 0xc9e   : > { %v3092_v19 = vadd.f32 %v1261_v18, %v1253_v17 }
 0xca0   : > { %2632 = vtanh.f32 %v3092_v19 }
 0xca1   : > { %v1366_v21 = vpop.permute.xlu1 %1365 }
 0xca2   : > { %v3096_v22 = vadd.f32 %v1366_v21, %v1358_v20 }
 0xca4   : > { %2634 = vtanh.f32 %v3096_v22 }
 0xcad   : > { %v2633_v23 = vpop.eup %2632 }
 0xcae   : > { %1266 = vrot.lane.b32.xlu0 %v2633_v23, %s2751_s13 }
 0xcb1   : > { %v2635_v24 = vpop.eup %2634 }
 0xcb2   : > { %1371 = vrot.lane.b32.xlu1 %v2635_v24, %s2751_s13 }
 0xd20   : > { %v1267_v25 = vpop.permute.xlu0 %1266 }
 0xd21   : > { %v1269_v26 = vmul.f32 %v2629_v11, %v1267_v25 }
 0xd23   : > { %1271 = vrot.lane.b32.xlu0 %v1269_v26, %s2752_s14 }
 0xd24   : > { %v1372_v27 = vpop.permute.xlu1 %1371 }
 0xd25   : > { %v1374_v28 = vmul.f32 %v2631_v14, %v1372_v27 }
 0xd27   : > { %1376 = vrot.lane.b32.xlu1 %v1374_v28, %s2752_s14 }
 0xd95   : > { %v1272_v29 = vpop.permute.xlu0 %1271 }
 0xd96   : > { %2237 = vst.msk [vmem:[%s2817_s12 + $0x8] sm:$0x3] %vm429_vm3, %v1272_v29  ;;  %2470 = vmatmul.mubr.msk.f32.vlgmr.msra.gmra.mxu0 %vm322_vm2, %v1272_v29 }
 0xd97   : > { %2484 = vmatpush3.msra.mxu0 %v2828_v1  ;;  %2491 = vmatprep.mubr.msk.f32.mxu0 %vm2750_vm1, %v2749_v3 }
 0xd98   : > { %2485 = vmatprep.subr.mxu0 %v2749_v3 }
 0xd99   : > { %v1377_v30 = vpop.permute.xlu1 %1376  ;;  %2486 = vmatpush3.msra.mxu0 %v2840_v4 }
 0xd9a   : > { %2241 = vst.msk [vmem:[%s2822_s15 + $0x6] sm:$0x3] %vm429_vm3, %v1377_v30  ;;  %2481 = vmatmul.mubr.msk.f32.vlgmr.msra.gmra.mxu1 %vm322_vm2, %v1377_v30  ;;  %2487 = vmatprep.subr.mxu0 %v2749_v3 }
 0xd9b   : > { %2488 = vmatpush3.msra.mxu0 %v2854_v6  ;;  %2495 = vmatpush3.msra.mxu1 %v2833_v2 }
 0xd9c   : > { %2489 = vmatprep.subr.mxu0 %v2749_v3  ;;  %2496 = vmatprep.subr.mxu1 %v2749_v3 }
 0xd9d   : > { %2490 = vmatpush3.msra.mxu0 %v2868_v8  ;;  %2497 = vmatpush3.msra.mxu1 %v2845_v5 }
 0xd9e   : > { %2498 = vmatprep.subr.mxu1 %v2749_v3  ;;  %2502 = vmatprep.mubr.msk.f32.mxu1 %vm2750_vm1, %v2749_v3 }
 0xd9f   : > { %2499 = vmatpush3.msra.mxu1 %v2861_v7  ;;  %2505 = vmatprep.subr.mxu0 %v2749_v3 }
 0xda0   : > { %2500 = vmatprep.subr.mxu1 %v2749_v3 }
 0xda1   : > { %2501 = vmatpush3.msra.mxu1 %v2876_v10 }
 0xda2   : > { %2516 = vmatprep.subr.mxu1 %v2749_v3 }
 0xe56   : > { %v1451_v32 = vpop.f32.mrf.mxu0 }
 0xe57   : > { %v1455_v33 = vadd.f32 %v2242_v31, %v1451_v32 }
 0xe58   : > { %v2471_v34 = vpop.f32.mrf.mxu0 }
 0xe59   : > { %2636 = vtanh.f32 %v1455_v33  ;;  %v2244_v41 = vmul.f32 -1.442695, %v1455_v33 }
 0xe5a   : > { %v1556_v36 = vpop.f32.mrf.mxu1 }
 0xe5b   : > { %v1560_v37 = vadd.f32 %v2246_v35, %v1556_v36 }
 0xe5c   : > { %v2482_v38 = vpop.f32.mrf.mxu1 }
 0xe5d   : > { %2638 = vtanh.f32 %v1560_v37  ;;  %v2248_v42 = vmul.f32 -1.442695, %v1560_v37 }
 0xe5e   : > { %2640 = vpow2.f32 %v2244_v41 }
 0xe5f   : > { %2642 = vpow2.f32 %v2248_v42 }
 0xe66   : > { %v2637_v39 = vpop.eup %2636 }
 0xe67   : > { %1465 = vrot.lane.b32.xlu0 %v2637_v39, %s2751_s13  ;;  %v2258_v39 = vld [vmem:[%s2807_s29 + $0xe] sm:$0x3] }
 0xe6a   : > { %v2639_v40 = vpop.eup %2638 }
 0xe6b   : > { %1570 = vrot.lane.b32.xlu1 %v2639_v40, %s2751_s13  ;;  %v2641_v43 = vpop.eup %2640 }
 0xe6c   : > { %v1459_v44 = vadd.f32 1.0, %v2641_v43  ;;  %v2643_v45 = vpop.eup %2642  ;;  %v1906_v43 = vld [vmem:[%s2812_s9] sm:$0x3] }
 0xe6d   : > { %v1564_v46 = vadd.f32 1.0, %v2643_v45 }
 0xe6e   : > { %2644 = vrcp.f32 %v1459_v44 }
 0xe6f   : > { %2646 = vrcp.f32 %v1564_v46 }
 0xe7b   : > { %v2645_v47 = vpop.eup %2644 }
 0xe7c   : > { %v2647_v50 = vpop.eup %2646  ;;  %v1463_v53 = vmul.f32 %v2645_v47, %v3092_v19 }
 0xe7d   : > { %v1568_v56 = vmul.f32 %v2647_v50, %v3096_v22 }
 0xed9   : > { %v1466_v48 = vpop.permute.xlu0 %1465 }
 0xeda   : > { %v1468_v49 = vmul.f32 %v2645_v47, %v1466_v48 }
 0xedc   : > { %1470 = vrot.lane.b32.xlu0 %v1468_v49, %s2751_s13 }
 0xedd   : > { %v1571_v51 = vpop.permute.xlu1 %1570 }
 0xede   : > { %v1573_v52 = vmul.f32 %v2647_v50, %v1571_v51 }
 0xee0   : > { %1575 = vrot.lane.b32.xlu1 %v1573_v52, %s2751_s13 }
 0xf4e   : > { %v1471_v54 = vpop.permute.xlu0 %1470 }
 0xf4f   : > { %v3136_v55 = vadd.f32 %v1471_v54, %v1463_v53 }
 0xf51   : > { %2648 = vtanh.f32 %v3136_v55 }
 0xf52   : > { %v1576_v57 = vpop.permute.xlu1 %1575 }
 0xf53   : > { %v3140_v58 = vadd.f32 %v1576_v57, %v1568_v56 }
 0xf55   : > { %2650 = vtanh.f32 %v3140_v58 }
 0xf5e   : > { %v2649_v59 = vpop.eup %2648 }
 0xf5f   : > { %1476 = vrot.lane.b32.xlu0 %v2649_v59, %s2751_s13 }
 0xf62   : > { %v2651_v60 = vpop.eup %2650 }
 0xf63   : > { %1581 = vrot.lane.b32.xlu1 %v2651_v60, %s2751_s13 }
 0xfd1   : > { %v1477_v61 = vpop.permute.xlu0 %1476 }
 0xfd2   : > { %v1479_v62 = vmul.f32 %v2645_v47, %v1477_v61 }
 0xfd4   : > { %1481 = vrot.lane.b32.xlu0 %v1479_v62, %s2752_s14 }
 0xfd5   : > { %v1582_v63 = vpop.permute.xlu1 %1581 }
 0xfd6   : > { %v1584_v0 = vmul.f32 %v2647_v50, %v1582_v63 }
 0xfd8   : > { %1586 = vrot.lane.b32.xlu1 %v1584_v0, %s2752_s14 }
0x1046   : > { %v1482_v9 = vpop.permute.xlu0 %1481 }
0x1047   : > { %2245 = vst.msk [vmem:[%s2817_s12 + $0xa] sm:$0x3] %vm429_vm3, %v1482_v9  ;;  %2492 = vmatmul.mubr.msk.f32.vlgmr.msra.gmra.mxu0 %vm322_vm2, %v1482_v9 }
0x1048   : > { %2506 = vmatpush3.msra.mxu0 %v2828_v1  ;;  %2513 = vmatprep.mubr.msk.f32.mxu0 %vm2750_vm1, %v2749_v3  ;;  %v2250_v1 = vld [vmem:[%s2807_s29 + $0xc] sm:$0x3]  ;;  %s2753_s29 = smov 96  }
0x1049   : > { %2507 = vmatprep.subr.mxu0 %v2749_v3 }
0x104a   : > { %v1587_v11 = vpop.permute.xlu1 %1586  ;;  %2508 = vmatpush3.msra.mxu0 %v2840_v4 }
0x104b   : > { %2249 = vst.msk [vmem:[%s2822_s15 + $0x4] sm:$0x3] %vm429_vm3, %v1587_v11  ;;  %2503 = vmatmul.mubr.msk.f32.vlgmr.msra.gmra.mxu1 %vm322_vm2, %v1587_v11  ;;  %2509 = vmatprep.subr.mxu0 %v2749_v3 }
0x104c   : > { %2510 = vmatpush3.msra.mxu0 %v2854_v6  ;;  %2517 = vmatpush3.msra.mxu1 %v2833_v2 }
0x104d   : > { %2511 = vmatprep.subr.mxu0 %v2749_v3  ;;  %2518 = vmatprep.subr.mxu1 %v2749_v3 }
0x104e   : > { %2512 = vmatpush3.msra.mxu0 %v2868_v8  ;;  %2519 = vmatpush3.msra.mxu1 %v2845_v5 }
0x104f   : > { %2520 = vmatprep.subr.mxu1 %v2749_v3  ;;  %2524 = vmatprep.mubr.msk.f32.mxu1 %vm2750_vm1, %v2749_v3 }
0x1050   : > { %2521 = vmatpush3.msra.mxu1 %v2861_v7 }
0x1051   : > { %2522 = vmatprep.subr.mxu1 %v2749_v3 }
0x1052   : > { %2523 = vmatpush3.msra.mxu1 %v2876_v10 }
0x1107   : > { %v1661_v2 = vpop.f32.mrf.mxu0 }
0x1108   : > { %v1665_v4 = vadd.f32 %v2250_v1, %v1661_v2 }
0x1109   : > { %v2493_v6 = vpop.f32.mrf.mxu0 }
0x110a   : > { %2652 = vtanh.f32 %v1665_v4  ;;  %v2252_v7 = vmul.f32 -1.442695, %v1665_v4 }
0x110b   : > { %v1766_v8 = vpop.f32.mrf.mxu1 }
0x110c   : > { %v1770_v13 = vadd.f32 %v2254_v12, %v1766_v8 }
0x110d   : > { %v2504_v5 = vpop.f32.mrf.mxu1 }
0x110e   : > { %2654 = vtanh.f32 %v1770_v13  ;;  %v2256_v3 = vmul.f32 -1.442695, %v1770_v13 }
0x110f   : > { %2656 = vpow2.f32 %v2252_v7 }
0x1110   : > { %2658 = vpow2.f32 %v2256_v3 }
0x1117   : > { %v2653_v14 = vpop.eup %2652 }
0x1118   : > { %1675 = vrot.lane.b32.xlu0 %v2653_v14, %s2751_s13 }
0x111b   : > { %v2655_v15 = vpop.eup %2654 }
0x111c   : > { %1780 = vrot.lane.b32.xlu1 %v2655_v15, %s2751_s13  ;;  %v2657_v10 = vpop.eup %2656 }
0x111d   : > { %v1669_v16 = vadd.f32 1.0, %v2657_v10  ;;  %v2659_v17 = vpop.eup %2658 }
0x111e   : > { %v1774_v18 = vadd.f32 1.0, %v2659_v17 }
0x111f   : > { %2660 = vrcp.f32 %v1669_v16 }
0x1120   : > { %2662 = vrcp.f32 %v1774_v18 }
0x112c   : > { %v2661_v19 = vpop.eup %2660 }
0x112d   : > { %v2663_v22 = vpop.eup %2662  ;;  %v1673_v25 = vmul.f32 %v2661_v19, %v3136_v55 }
0x112e   : > { %v1778_v28 = vmul.f32 %v2663_v22, %v3140_v58 }
0x118a   : > { %v1676_v20 = vpop.permute.xlu0 %1675 }
0x118b   : > { %v1678_v21 = vmul.f32 %v2661_v19, %v1676_v20 }
0x118d   : > { %1680 = vrot.lane.b32.xlu0 %v1678_v21, %s2751_s13 }
0x118e   : > { %v1781_v23 = vpop.permute.xlu1 %1780 }
0x118f   : > { %v1783_v24 = vmul.f32 %v2663_v22, %v1781_v23 }
0x1191   : > { %1785 = vrot.lane.b32.xlu1 %v1783_v24, %s2751_s13 }
0x11ff   : > { %v1681_v26 = vpop.permute.xlu0 %1680 }
0x1200   : > { %v1683_v27 = vadd.f32 %v1681_v26, %v1673_v25 }
0x1202   : > { %2664 = vtanh.f32 %v1683_v27 }
0x1203   : > { %v1786_v29 = vpop.permute.xlu1 %1785 }
0x1204   : > { %v1788_v30 = vadd.f32 %v1786_v29, %v1778_v28 }
0x1206   : > { %2666 = vtanh.f32 %v1788_v30 }
0x120f   : > { %v2665_v31 = vpop.eup %2664 }
0x1210   : > { %1686 = vrot.lane.b32.xlu0 %v2665_v31, %s2751_s13 }
0x1213   : > { %v2667_v32 = vpop.eup %2666 }
0x1214   : > { %1791 = vrot.lane.b32.xlu1 %v2667_v32, %s2751_s13 }
0x1282   : > { %v1687_v33 = vpop.permute.xlu0 %1686 }
0x1283   : > { %v1689_v34 = vmul.f32 %v2661_v19, %v1687_v33 }
0x1285   : > { %1691 = vrot.lane.b32.xlu0 %v1689_v34, %s2752_s14 }
0x1286   : > { %v1792_v35 = vpop.permute.xlu1 %1791 }
0x1287   : > { %v1794_v36 = vmul.f32 %v2663_v22, %v1792_v35 }
0x1289   : > { %1796 = vrot.lane.b32.xlu1 %v1794_v36, %s2752_s14 }
0x12f7   : > { %v1692_v37 = vpop.permute.xlu0 %1691 }
0x12f8   : > { %2253 = vst.msk [vmem:[%s2817_s12 + $0xc] sm:$0x3] %vm429_vm3, %v1692_v37  ;;  %2514 = vmatmul.mubr.msk.f32.vlgmr.msra.gmra.mxu0 %vm322_vm2, %v1692_v37 }
0x12fb   : > { %v1797_v38 = vpop.permute.xlu1 %1796 }
0x12fc   : > { %2257 = vst.msk [vmem:[%s2822_s15 + $0x2] sm:$0x3] %vm429_vm3, %v1797_v38  ;;  %2525 = vmatmul.mubr.msk.f32.vlgmr.msra.gmra.mxu1 %vm322_vm2, %v1797_v38 }
0x13b8   : > { %v1871_v40 = vpop.f32.mrf.mxu0 }
0x13b9   : > { %v1875_v41 = vadd.f32 %v2258_v39, %v1871_v40 }
0x13ba   : > { %v2515_v42 = vpop.f32.mrf.mxu0 }
0x13bb   : > { %2668 = vtanh.f32 %v1875_v41  ;;  %v2260_v49 = vmul.f32 -1.442695, %v1875_v41 }
0x13bc   : > { %v1975_v44 = vpop.f32.mrf.mxu1 }
0x13bd   : > { %v1979_v45 = vadd.f32 %v1975_v44, %v1906_v43 }
0x13be   : > { %v2526_v46 = vpop.f32.mrf.mxu1 }
0x13bf   : > { %2670 = vtanh.f32 %v1979_v45  ;;  %v2263_v50 = vmul.f32 -1.442695, %v1979_v45 }
0x13c0   : > { %2672 = vpow2.f32 %v2260_v49 }
0x13c1   : > { %2674 = vpow2.f32 %v2263_v50 }
0x13c8   : > { %v2669_v47 = vpop.eup %2668 }
0x13c9   : > { %1885 = vrot.lane.b32.xlu0 %v2669_v47, %s2751_s13 }
0x13cc   : > { %v2671_v48 = vpop.eup %2670 }
0x13cd   : > { %1989 = vrot.lane.b32.xlu1 %v2671_v48, %s2751_s13  ;;  %v2673_v51 = vpop.eup %2672 }
0x13ce   : > { %v1879_v52 = vadd.f32 1.0, %v2673_v51  ;;  %v2675_v53 = vpop.eup %2674 }
0x13cf   : > { %v1983_v54 = vadd.f32 1.0, %v2675_v53 }
0x13d0   : > { %2676 = vrcp.f32 %v1879_v52 }
0x13d1   : > { %2678 = vrcp.f32 %v1983_v54 }
0x13dd   : > { %v2677_v55 = vpop.eup %2676 }
0x13de   : > { %v2679_v58 = vpop.eup %2678  ;;  %v1883_v61 = vmul.f32 %v2677_v55, %v1683_v27 }
0x13df   : > { %v1987_v0 = vmul.f32 %v2679_v58, %v1788_v30 }
0x143b   : > { %v1886_v56 = vpop.permute.xlu0 %1885 }
0x143c   : > { %v1888_v57 = vmul.f32 %v2677_v55, %v1886_v56 }
0x143e   : > { %1890 = vrot.lane.b32.xlu0 %v1888_v57, %s2751_s13 }
0x143f   : > { %v1990_v59 = vpop.permute.xlu1 %1989 }
0x1440   : > { %v1992_v60 = vmul.f32 %v2679_v58, %v1990_v59 }
0x1442   : > { %1994 = vrot.lane.b32.xlu1 %v1992_v60, %s2751_s13 }
0x14b0   : > { %v1891_v62 = vpop.permute.xlu0 %1890 }
0x14b1   : > { %v1893_v63 = vadd.f32 %v1891_v62, %v1883_v61 }
0x14b3   : > { %2680 = vtanh.f32 %v1893_v63 }
0x14b4   : > { %v1995_v9 = vpop.permute.xlu1 %1994 }
0x14b5   : > { %v1997_v11 = vadd.f32 %v1995_v9, %v1987_v0 }
0x14b7   : > { %2682 = vtanh.f32 %v1997_v11 }
0x14c0   : > { %v2681_v1 = vpop.eup %2680 }
0x14c1   : > { %1896 = vrot.lane.b32.xlu0 %v2681_v1, %s2751_s13 }
0x14c4   : > { %v2683_v2 = vpop.eup %2682 }
0x14c5   : > { %2000 = vrot.lane.b32.xlu1 %v2683_v2, %s2751_s13 }
0x1533   : > { %v1897_v4 = vpop.permute.xlu0 %1896 }
0x1534   : > { %v1899_v6 = vmul.f32 %v2677_v55, %v1897_v4 }
0x1536   : > { %1901 = vrot.lane.b32.xlu0 %v1899_v6, %s2752_s14 }
0x1537   : > { %v2001_v12 = vpop.permute.xlu1 %2000 }
0x1538   : > { %v2003_v8 = vmul.f32 %v2679_v58, %v2001_v12 }
0x153a   : > { %2005 = vrot.lane.b32.xlu1 %v2003_v8, %s2752_s14  ;;  %2011 = vrot.lane.b32.xlu0 %v1893_v63, %s2753_s29 }
0x153e   : > { %2017 = vrot.lane.b32.xlu1 %v1997_v11, %s2753_s29 }
0x15a8   : > { %v1902_v13 = vpop.permute.xlu0 %1901 }
0x15a9   : > { %2261 = vst.msk [vmem:[%s2817_s12 + $0xe] sm:$0x3] %vm429_vm3, %v1902_v13  ;;  %2009 = vst.msk [vmem:[#allocation2] sm:$0x3] %vm429_vm3, %v1902_v13 }
0x15ac   : > { %v2006_v5 = vpop.permute.xlu1 %2005  ;;  %v2012_v14 = vpop.permute.xlu0 %2011 }
0x15ad   : > { %2008 = vst.msk [vmem:[%s2822_s15] sm:$0x3] %vm429_vm3, %v2006_v5  ;;  %2015 = vst.msk [vmem:[#allocation4] sm:$0x3] %vm429_vm3, %v2006_v5  ;;  %2024 = sbr.rel (%p2264_p6) target bundleno = 5556 (0x15b4), region = 40 }
0x15ae   : > { %2014 = vst.msk [vmem:[#allocation3] sm:$0x3] %vm429_vm3, %v2012_v14 }
0x15b0   : > { %v2018_v15 = vpop.permute.xlu1 %2017 }
0x15b1   : > { %2020 = vst.msk [vmem:[#allocation5] sm:$0x3] %vm429_vm3, %v2018_v15 }
0x15b2   : > { %2025 = vst.msk [vmem:[#allocation6] sm:$0x3] %vm429_vm3, %v1902_v13  ;;  %2027 = vst.msk [vmem:[#allocation6 + $0x2] sm:$0x3] %vm429_vm3, %v2006_v5 }
0x15b3   : > { %2028 = vst.msk [vmem:[#allocation8] sm:$0x3] %vm429_vm3, %v2012_v14  ;;  %2030 = vst.msk [vmem:[#allocation8 + $0x2] sm:$0x3] %vm429_vm3, %v2018_v15 }
0x15b4 PF: > { %p2535_p7 = scmp.eq.s32.totalorder %s2798_s22, 1  ;;  %s2754_s9 = smov [#allocation6]  }
0x15b5   : > { %s2057_s12 = sshll.u32 %s2754_s9, 4  ;;  %s2058_s12 = int_to_ptr.vmem [resolvable:$true] %s2057_s12 }
0x15b6   : > { %s2684_s15 = scalar_lea.vmem %s2058_s12, 64  ;;  %p2691_p11 = scmp.lt.s32.totalorder %s2058_s12, %s2058_s12 }
0x15b7   : > { %p2685_p8 = scmp.ne.s32.totalorder %s2058_s12, %s2684_s15  ;;  %p2692_p12 = scmp.lt.s32.totalorder %s2684_s15, %s2684_s15 }
0x15b9   : > { %p2686_p9 = pnand %p2685_p8, %p2535_p7  ;;  %p2693_p13 = por %p2692_p12, %p2691_p11 }
0x15bb   : > { %p2687_p10 = pneg %p2686_p9 }
0x15bd   : > { %p2694_p0 = pnand %p2693_p13, %p2687_p10 }
0x15bf   : > { %2697 = shalt.err (!%p2694_p0)
}
0x15c0   : > { %s2755_s16 = smov 2   ;;  %s2756_s19 = smov [#allocation8]  }
0x15c1   : > { %2528 = dma.vmem_to_hbm [thread:$0]  (%p2535_p7), %s2058_s12, 64, %s3247_s5, [#allocation7], %s2751_s13, %s2751_s13, %s2755_s16  }
0x15c2   : > { %s2070_s20 = sshll.u32 %s2756_s19, 4  ;;  %s2071_s20 = int_to_ptr.vmem [resolvable:$true] %s2070_s20 }
0x15c3   : > { %s2708_s23 = scalar_lea.vmem %s2071_s20, 64  ;;  %p2715_p4 = scmp.lt.s32.totalorder %s2071_s20, %s2071_s20 }
0x15c4   : > { %p2709_p1 = scmp.ne.s32.totalorder %s2071_s20, %s2708_s23  ;;  %p2716_p5 = scmp.lt.s32.totalorder %s2708_s23, %s2708_s23 }
0x15c6   : > { %p2710_p2 = pnand %p2709_p1, %p2535_p7  ;;  %p2717_p6 = por %p2716_p5, %p2715_p4 }
0x15c8   : > { %p2711_p3 = pneg %p2710_p2 }
0x15ca   : > { %p2718_p8 = pnand %p2717_p6, %p2711_p3 }
0x15cc   : > { %2721 = shalt.err (!%p2718_p8)
}
0x15cd   : > { %2530 = dma.vmem_to_hbm [thread:$0]  (%p2535_p7), %s2071_s20, 64, %s3248_s6, [#allocation9], %s2751_s13, %s2751_s13, %s2755_s16  }
0x15ce   : > { %2737 = dma.done.wait (%p2535_p7), [#allocation7], 64  }
0x15cf   : > { %2739 = vsyncadd (%p2535_p7), [#allocation7], 4294967232 }
0x15d0   : > { %2741 = dma.done.wait (%p2535_p7), [#allocation9], 64  }
0x15d1   : > { %2743 = vsyncadd (%p2535_p7), [#allocation9], 4294967232 }
0x15d2 PF: > { %s19_s21 = sadd.s32 1, %s2746_s21  }
0x15d3   : > { %p16_p9 = scmp.ge.s32.totalorder %s19_s21, 4  }
0x15d5   :  { %18 = sbr.rel (!%p16_p9) target bundleno = 2 (0x2), region = 133 }
0x15da   :  { %2107 = vsyncpa [#allocation7], 1 }
0x15db   :  { %2109 = vsyncpa [#allocation7 + $0x1], 1 }
0x15dc   :  { %2110 = vsyncpa [#allocation9], 1 }

</bundles_post_ra>
